<compile_context>
chip_gen: v5e
topology: v5e:2x2
jax: 0.10.0
libtpu: 0.0.40
codegen_flags: <defaults>
</compile_context>

<pallas_src>
import functools
import math

import jax
import jax.numpy as jnp
from jax.experimental import pallas as pl
from jax.experimental.pallas import tpu as pltpu


CLS_ROWS = 8  # classifier computed on an 8-row slab (row 0 = [CLS]) -> dense stores


# ---------------------------------------------------------------------------
# in-kernel helpers
# ---------------------------------------------------------------------------
def _layer_norm(x, g, b, eps=1e-12):
    # one-pass stats: both reductions act on raw x (overlap on the XLU),
    # var = E[x^2] - mean^2
    mean = jnp.mean(x, axis=-1, keepdims=True)
    mean_sq = jnp.mean(x * x, axis=-1, keepdims=True)
    var = mean_sq - mean * mean
    return (x - mean) * jax.lax.rsqrt(var + eps) * g + b


def _softmax_last(s):
    m = jnp.max(s, axis=-1, keepdims=True)
    e = jnp.exp(s - m)
    return e * pl.reciprocal(jnp.sum(e, axis=-1, keepdims=True), approx=True)


def _gelu(x):
    # TODO(synk): HF BERT default is exact erf-GELU; tanh approximation (EUP)
    # differs at the ~1e-3 level.
    c = 0.7978845608028654  # sqrt(2/pi)
    return 0.5 * x * (1.0 + jnp.tanh(c * (x + 0.044715 * x * x * x)))


# ---------------------------------------------------------------------------
# fused BERT kernel body: one (batch_tile, layer) grid step
# ---------------------------------------------------------------------------
def bert_kernel(emb_ref, ln_e_g_ref, ln_e_b_ref,
                qkv_w_ref, qkv_b_ref, ao_w_ref, ao_b_ref,
                ln1_g_ref, ln1_b_ref,
                f1_w_ref, f1_b_ref, f2_w_ref, f2_b_ref,
                ln2_g_ref, ln2_b_ref,
                pool_w_ref, pool_b_ref,
                cls1_w_ref, cls1_b_ref, cls2_w_ref, cls2_b_ref,
                out_ref, x_scratch, *, num_heads):
    _, L, H = emb_ref.shape
    NH = num_heads
    DH = H // NH
    layer = pl.program_id(1)
    n_layers = pl.num_programs(1)
    bf16 = jnp.bfloat16
    f32 = jnp.float32

    # --- embeddings LayerNorm, once per batch tile (dropout = identity, eval) ---
    @pl.when(layer == 0)
    def _():
        x_scratch[...] = _layer_norm(emb_ref[0], ln_e_g_ref[...], ln_e_b_ref[...])

    x = x_scratch[...]                                               # (L, H) f32

    # --- self-attention: fused QKV matmul, all heads batched into one einsum ---
    qkv = (jnp.dot(x.astype(bf16), qkv_w_ref[0],
                   preferred_element_type=f32) + qkv_b_ref[0])       # (L, 3H)
    # 1/sqrt(DH) is already folded into the Q columns of qkv_w / qkv_b.
    q = jnp.swapaxes(qkv[:, 0 * H:1 * H].reshape(L, NH, DH), 0, 1)   # (NH, L, DH)
    k = jnp.swapaxes(qkv[:, 1 * H:2 * H].reshape(L, NH, DH), 0, 1)
    v = jnp.swapaxes(qkv[:, 2 * H:3 * H].reshape(L, NH, DH), 0, 1)

    # TODO(synk): no attention mask (BertModel default = all-ones); padded
    # sequences with a real attention_mask are not supported here.
    s = jnp.einsum('hqd,hkd->hqk', q.astype(bf16), k.astype(bf16),
                   preferred_element_type=f32)                        # (NH, L, L)
    a = _softmax_last(s)
    ctx = jnp.einsum('hqk,hkd->hqd', a.astype(bf16), v.astype(bf16),
                     preferred_element_type=f32)                      # (NH, L, DH)
    ctx = jnp.swapaxes(ctx, 0, 1).reshape(L, H)

    attn = (jnp.dot(ctx.astype(bf16), ao_w_ref[0],
                    preferred_element_type=f32) + ao_b_ref[0])
    x = _layer_norm(x + attn, ln1_g_ref[0], ln1_b_ref[0])

    # --- feed-forward ---
    hmid = _gelu(jnp.dot(x.astype(bf16), f1_w_ref[0],
                         preferred_element_type=f32) + f1_b_ref[0])
    ffn = (jnp.dot(hmid.astype(bf16), f2_w_ref[0],
                   preferred_element_type=f32) + f2_b_ref[0])
    x = _layer_norm(x + ffn, ln2_g_ref[0], ln2_b_ref[0])

    x_scratch[...] = x

    # --- pooler + classifier: last layer only ---
    @pl.when(layer == n_layers - 1)
    def _():
        # Compute on an 8-row slab (row 0 is [CLS]) so the final store is a
        # full unmasked (8, 128) tile; the wrapper slices row 0 / real classes.
        x8 = x[0:CLS_ROWS, :]
        pooled = jnp.tanh(jnp.dot(x8.astype(bf16), pool_w_ref[...],
                                  preferred_element_type=f32) + pool_b_ref[...])
        # dropout(pooled) = identity in eval mode
        hc = jnp.maximum(
            jnp.dot(pooled.astype(bf16), cls1_w_ref[...],
                    preferred_element_type=f32) + cls1_b_ref[...], 0.0)
        out_ref[0] = (jnp.dot(hc.astype(bf16), cls2_w_ref[...],
                              preferred_element_type=f32) + cls2_b_ref[...])


# ---------------------------------------------------------------------------
# wrapper: Pure_Bert.forward(input_ids, token_type_ids)
# ---------------------------------------------------------------------------
def _vmem_limit_bytes():
    try:
        cap = int(pltpu.get_tpu_info().vmem_capacity_bytes)
    except Exception:
        cap = 64 * 1024 * 1024
    # leave headroom for pipeline double buffers:
    # ~51 MiB on v7x (64 MiB physical), ~102 MiB on v5e/v6e (128 MiB).
    return min(int(cap * 0.8), 110 * 1024 * 1024)


def pure_bert_forward(params, input_ids, token_type_ids, *, num_heads):
    B, L = input_ids.shape
    H = params['word_emb'].shape[1]
    NL = params['qkv_w'].shape[0]
    I = params['f1_w'].shape[2]
    CLS_H = params['cls1_w'].shape[1]
    ncls = params['cls2_w'].shape[1]
    DH = H // num_heads
    assert L >= CLS_ROWS, "sequence length must be >= 8"
    bf16 = jnp.bfloat16

    # --- embedding gathers (data-dependent -> JAX glue), summed once ---
    word = jnp.take(params['word_emb'], input_ids, axis=0)           # (B, L, H)
    pos = params['pos_emb'][:L][None, :, :]                          # (1, L, H)
    tok = jnp.take(params['type_emb'], token_type_ids, axis=0)       # (B, L, H)
    emb = word + pos + tok

    # --- weight prep: fold 1/sqrt(DH) into Q, cast matmul weights to bf16 ---
    scale = 1.0 / math.sqrt(DH)
    qkv_w = params['qkv_w'].at[:, :, :H].multiply(scale).astype(bf16)
    qkv_b = params['qkv_b'].at[:, :, :H].multiply(scale)

    npad = ((ncls + 127) // 128) * 128
    cls2_w = jnp.pad(params['cls2_w'], ((0, 0), (0, npad - ncls))).astype(bf16)
    cls2_b = jnp.pad(params['cls2_b'], ((0, 0), (0, npad - ncls)))

    args = (
        emb,
        params['ln_emb_g'], params['ln_emb_b'],
        qkv_w, qkv_b,
        params['ao_w'].astype(bf16), params['ao_b'],
        params['ln1_g'], params['ln1_b'],
        params['f1_w'].astype(bf16), params['f1_b'],
        params['f2_w'].astype(bf16), params['f2_b'],
        params['ln2_g'], params['ln2_b'],
        params['pool_w'].astype(bf16), params['pool_b'],
        params['cls1_w'].astype(bf16), params['cls1_b'],
        cls2_w, cls2_b,
    )

    lw = lambda b, l: (l, 0, 0)       # per-layer stacked weights (streamed)
    cw = lambda b, l: (0, 0)          # layer-invariant 2-D params (DMA'd once)
    in_specs = [
        pl.BlockSpec((1, L, H), lambda b, l: (b, 0, 0)),             # embeddings
        pl.BlockSpec((1, H), cw), pl.BlockSpec((1, H), cw),          # emb LN
        pl.BlockSpec((1, H, 3 * H), lw), pl.BlockSpec((1, 1, 3 * H), lw),
        pl.BlockSpec((1, H, H), lw), pl.BlockSpec((1, 1, H), lw),
        pl.BlockSpec((1, 1, H), lw), pl.BlockSpec((1, 1, H), lw),
        pl.BlockSpec((1, H, I), lw), pl.BlockSpec((1, 1, I), lw),
        pl.BlockSpec((1, I, H), lw), pl.BlockSpec((1, 1, H), lw),
        pl.BlockSpec((1, 1, H), lw), pl.BlockSpec((1, 1, H), lw),
        pl.BlockSpec((H, H), cw), pl.BlockSpec((1, H), cw),          # pooler
        pl.BlockSpec((H, CLS_H), cw), pl.BlockSpec((1, CLS_H), cw),  # classifier 1
        pl.BlockSpec((CLS_H, npad), cw), pl.BlockSpec((1, npad), cw),  # classifier 2
    ]
    out_spec = pl.BlockSpec((1, CLS_ROWS, npad), lambda b, l: (b, 0, 0))
    out_shape = jax.ShapeDtypeStruct((B, CLS_ROWS, npad), jnp.float32)

    # rough cost estimate so XLA schedules the surrounding gathers/slice well
    flops_layer = (2 * L * H * 3 * H
                   + 2 * 2 * num_heads * L * L * DH
                   + 2 * L * H * H
                   + 2 * 2 * L * H * I)
    flops = B * NL * flops_layer + B * 2 * CLS_ROWS * (H * H + H * CLS_H + CLS_H * npad)
    transcend = B * NL * (num_heads * L * L + L * I) + B * CLS_ROWS * H
    bytes_accessed = (sum(int(a.size) * a.dtype.itemsize for a in args)
                      + int(emb.size) * 4 + B * CLS_ROWS * npad * 4)

    kernel = functools.partial(bert_kernel, num_heads=num_heads)
    logits_padded = pl.pallas_call(
        kernel,
        out_shape=out_shape,
        grid_spec=pltpu.PrefetchScalarGridSpec(
            num_scalar_prefetch=0,
            grid=(B, NL),
            in_specs=in_specs,
            out_specs=out_spec,
            scratch_shapes=[pltpu.VMEM((L, H), jnp.float32)],
        ),
        compiler_params=pltpu.CompilerParams(
            dimension_semantics=("parallel", "arbitrary"),
            vmem_limit_bytes=_vmem_limit_bytes(),
        ),
        cost_estimate=pl.CostEstimate(
            flops=int(flops),
            transcendentals=int(transcend),
            bytes_accessed=int(bytes_accessed)),
    )(*args)

    return logits_padded[:, 0, :ncls]


# ---------------------------------------------------------------------------
# deterministic parameter init (f32 masters; bf16 cast happens at prep time)
# ---------------------------------------------------------------------------
def init_params(key, vocab, type_vocab, max_pos, H, NL, I, CLS_H, NCLS):
    keys = iter(jax.random.split(key, 32))

    def init(shape, scale=0.02):
        return scale * jax.random.normal(next(keys), shape, jnp.float32)

    return {
        # embeddings
        "word_emb": init((vocab, H), 1.0),
        "pos_emb": init((max_pos, H), 1.0),
        "type_emb": init((type_vocab, H), 1.0),
        "ln_emb_g": jnp.ones((1, H), jnp.float32),
        "ln_emb_b": jnp.zeros((1, H), jnp.float32),
        # encoder layers, stacked over NL; weights stored (in, out) for the MXU
        "qkv_w": init((NL, H, 3 * H)),
        "qkv_b": init((NL, 1, 3 * H)),
        "ao_w": init((NL, H, H)),
        "ao_b": init((NL, 1, H)),
        "ln1_g": jnp.ones((NL, 1, H), jnp.float32),
        "ln1_b": jnp.zeros((NL, 1, H), jnp.float32),
        "f1_w": init((NL, H, I)),
        "f1_b": init((NL, 1, I)),
        "f2_w": init((NL, I, H)),
        "f2_b": init((NL, 1, H)),
        "ln2_g": jnp.ones((NL, 1, H), jnp.float32),
        "ln2_b": jnp.zeros((NL, 1, H), jnp.float32),
        # pooler
        "pool_w": init((H, H)),
        "pool_b": init((1, H)),
        # classifier: Linear(H, CLS_H) + ReLU + Linear(CLS_H, NCLS)
        "cls1_w": init((H, CLS_H)),
        "cls1_b": init((1, CLS_H)),
        "cls2_w": init((CLS_H, NCLS)),
        "cls2_b": init((1, NCLS)),
    }


if __name__ == "__main__":
    B, L = 2, 8
    VOCAB, TYPE_VOCAB, MAX_POS = 100, 2, 32
    H, NL, NH, INTER = 128, 2, 2, 512
    CLS_H, NCLS = 256, 3

    key = jax.random.PRNGKey(0)
    k_par, k_ids = jax.random.split(key, 2)

    params = init_params(k_par, VOCAB, TYPE_VOCAB, MAX_POS, H, NL, INTER, CLS_H, NCLS)

    input_ids = jax.random.randint(k_ids, (B, L), 0, VOCAB, dtype=jnp.int32)
    token_type_ids = jnp.concatenate(
        [jnp.zeros((B, L // 2), jnp.int32), jnp.ones((B, L // 2), jnp.int32)],
        axis=1)

    fwd = jax.jit(pure_bert_forward, static_argnames=("num_heads",))
    logits = fwd(params, input_ids, token_type_ids, num_heads=NH)
    jax.block_until_ready(logits)

    assert logits.shape == (B, NCLS) and logits.dtype == jnp.float32
    assert bool(jnp.all(jnp.isfinite(logits)))
    print("KERNEL_OK")
</pallas_src>

<mosaic_0001>
module attributes {stable_mosaic.version = 11 : i64} {
  func.func @bert_kernel(%arg0: i32, %arg1: i32, %arg2: memref<1x8x128xf32, #tpu.memory_space<vmem>>, %arg3: memref<1x128xf32, #tpu.memory_space<vmem>>, %arg4: memref<1x128xf32, #tpu.memory_space<vmem>>, %arg5: memref<1x128x384xbf16, #tpu.memory_space<vmem>>, %arg6: memref<1x1x384xf32, #tpu.memory_space<vmem>>, %arg7: memref<1x128x128xbf16, #tpu.memory_space<vmem>>, %arg8: memref<1x1x128xf32, #tpu.memory_space<vmem>>, %arg9: memref<1x1x128xf32, #tpu.memory_space<vmem>>, %arg10: memref<1x1x128xf32, #tpu.memory_space<vmem>>, %arg11: memref<1x128x512xbf16, #tpu.memory_space<vmem>>, %arg12: memref<1x1x512xf32, #tpu.memory_space<vmem>>, %arg13: memref<1x512x128xbf16, #tpu.memory_space<vmem>>, %arg14: memref<1x1x128xf32, #tpu.memory_space<vmem>>, %arg15: memref<1x1x128xf32, #tpu.memory_space<vmem>>, %arg16: memref<1x1x128xf32, #tpu.memory_space<vmem>>, %arg17: memref<128x128xbf16, #tpu.memory_space<vmem>>, %arg18: memref<1x128xf32, #tpu.memory_space<vmem>>, %arg19: memref<128x256xbf16, #tpu.memory_space<vmem>>, %arg20: memref<1x256xf32, #tpu.memory_space<vmem>>, %arg21: memref<256x128xbf16, #tpu.memory_space<vmem>>, %arg22: memref<1x128xf32, #tpu.memory_space<vmem>>, %arg23: memref<1x8x128xf32, #tpu.memory_space<vmem>>, %arg24: memref<8x128xf32, #tpu.memory_space<vmem>>) attributes {dimension_semantics = [#tpu.dimension_semantics<parallel>, #tpu.dimension_semantics<arbitrary>], iteration_bounds = array<i64: 2, 2>, scalar_prefetch = 0 : i64, scratch_operands = 1 : i64, tpu.core_type = #tpu.core_type<tc>, window_params = [{transform_indices = @transform_0, window_bounds = array<i64: 1, 8, 128>}, {pipeline_mode = #tpu.pipeline_mode<synchronous>, transform_indices = @transform_1, window_bounds = array<i64: 1, 128>}, {pipeline_mode = #tpu.pipeline_mode<synchronous>, transform_indices = @transform_2, window_bounds = array<i64: 1, 128>}, {transform_indices = @transform_3, window_bounds = array<i64: 1, 128, 384>}, {transform_indices = @transform_4, window_bounds = array<i64: 1, 1, 384>}, {transform_indices = @transform_5, window_bounds = array<i64: 1, 128, 128>}, {transform_indices = @transform_6, window_bounds = array<i64: 1, 1, 128>}, {transform_indices = @transform_7, window_bounds = array<i64: 1, 1, 128>}, {transform_indices = @transform_8, window_bounds = array<i64: 1, 1, 128>}, {transform_indices = @transform_9, window_bounds = array<i64: 1, 128, 512>}, {transform_indices = @transform_10, window_bounds = array<i64: 1, 1, 512>}, {transform_indices = @transform_11, window_bounds = array<i64: 1, 512, 128>}, {transform_indices = @transform_12, window_bounds = array<i64: 1, 1, 128>}, {transform_indices = @transform_13, window_bounds = array<i64: 1, 1, 128>}, {transform_indices = @transform_14, window_bounds = array<i64: 1, 1, 128>}, {pipeline_mode = #tpu.pipeline_mode<synchronous>, transform_indices = @transform_15, window_bounds = array<i64: 128, 128>}, {pipeline_mode = #tpu.pipeline_mode<synchronous>, transform_indices = @transform_16, window_bounds = array<i64: 1, 128>}, {pipeline_mode = #tpu.pipeline_mode<synchronous>, transform_indices = @transform_17, window_bounds = array<i64: 128, 256>}, {pipeline_mode = #tpu.pipeline_mode<synchronous>, transform_indices = @transform_18, window_bounds = array<i64: 1, 256>}, {pipeline_mode = #tpu.pipeline_mode<synchronous>, transform_indices = @transform_19, window_bounds = array<i64: 256, 128>}, {pipeline_mode = #tpu.pipeline_mode<synchronous>, transform_indices = @transform_20, window_bounds = array<i64: 1, 128>}, {transform_indices = @transform_21, window_bounds = array<i64: 1, 8, 128>}]} {
    %c0_i32 = arith.constant 0 : i32
    %0 = arith.cmpi eq, %arg1, %c0_i32 : i32
    %1 = arith.extui %0 : i1 to i32
    %c0_i32_0 = arith.constant 0 : i32
    %2 = arith.cmpi ne, %1, %c0_i32_0 : i32
    scf.if %2 {
      %c0_62 = arith.constant 0 : index
      %c0_63 = arith.constant 0 : index
      %c0_64 = arith.constant 0 : index
      %134 = vector.load %arg2[%c0_62, %c0_63, %c0_64] : memref<1x8x128xf32, #tpu.memory_space<vmem>>, vector<1x8x128xf32>
      %135 = vector.shape_cast %134 : vector<1x8x128xf32> to vector<8x128xf32>
      %c0_65 = arith.constant 0 : index
      %c0_66 = arith.constant 0 : index
      %136 = vector.load %arg3[%c0_65, %c0_66] : memref<1x128xf32, #tpu.memory_space<vmem>>, vector<1x128xf32>
      %c0_67 = arith.constant 0 : index
      %c0_68 = arith.constant 0 : index
      %137 = vector.load %arg4[%c0_67, %c0_68] : memref<1x128xf32, #tpu.memory_space<vmem>>, vector<1x128xf32>
      %cst_69 = arith.constant dense<0.000000e+00> : vector<8xf32>
      %138 = vector.multi_reduction <add>, %135, %cst_69 [1] : vector<8x128xf32> to vector<8xf32>
      %139 = vector.shape_cast %138 : vector<8xf32> to vector<8x1xf32>
      %cst_70 = arith.constant 1.280000e+02 : f32
      %140 = vector.broadcast %cst_70 : f32 to vector<8x1xf32>
      %141 = arith.divf %139, %140 : vector<8x1xf32>
      %142 = arith.mulf %135, %135 : vector<8x128xf32>
      %cst_71 = arith.constant dense<0.000000e+00> : vector<8xf32>
      %143 = vector.multi_reduction <add>, %142, %cst_71 [1] : vector<8x128xf32> to vector<8xf32>
      %144 = vector.shape_cast %143 : vector<8xf32> to vector<8x1xf32>
      %cst_72 = arith.constant 1.280000e+02 : f32
      %145 = vector.broadcast %cst_72 : f32 to vector<8x1xf32>
      %146 = arith.divf %144, %145 : vector<8x1xf32>
      %147 = arith.mulf %141, %141 : vector<8x1xf32>
      %148 = arith.subf %146, %147 : vector<8x1xf32>
      %149 = vector.broadcast %141 : vector<8x1xf32> to vector<8x128xf32>
      %150 = arith.subf %135, %149 : vector<8x128xf32>
      %cst_73 = arith.constant 9.99999996E-13 : f32
      %151 = vector.broadcast %cst_73 : f32 to vector<8x1xf32>
      %152 = arith.addf %148, %151 : vector<8x1xf32>
      %153 = math.rsqrt %152 : vector<8x1xf32>
      %154 = vector.broadcast %153 : vector<8x1xf32> to vector<8x128xf32>
      %155 = arith.mulf %150, %154 : vector<8x128xf32>
      %156 = vector.broadcast %136 : vector<1x128xf32> to vector<8x128xf32>
      %157 = arith.mulf %155, %156 : vector<8x128xf32>
      %158 = vector.broadcast %137 : vector<1x128xf32> to vector<8x128xf32>
      %159 = arith.addf %157, %158 : vector<8x128xf32>
      %c0_74 = arith.constant 0 : index
      %c0_75 = arith.constant 0 : index
      %160 = vector.load %arg24[%c0_74, %c0_75] : memref<8x128xf32, #tpu.memory_space<vmem>>, vector<8x128xf32>
      tpu.vector_store %arg24[%c0_74, %c0_75], %159 {strides = array<i32>} : memref<8x128xf32, #tpu.memory_space<vmem>>, vector<8x128xf32>,
    } else {
    }
    %c0 = arith.constant 0 : index
    %c0_1 = arith.constant 0 : index
    %3 = vector.load %arg24[%c0, %c0_1] : memref<8x128xf32, #tpu.memory_space<vmem>>, vector<8x128xf32>
    %4 = arith.truncf %3 : vector<8x128xf32> to vector<8x128xbf16>
    %c0_2 = arith.constant 0 : index
    %c0_3 = arith.constant 0 : index
    %c0_4 = arith.constant 0 : index
    %5 = vector.load %arg5[%c0_2, %c0_3, %c0_4] : memref<1x128x384xbf16, #tpu.memory_space<vmem>>, vector<1x128x384xbf16>
    %6 = vector.shape_cast %5 : vector<1x128x384xbf16> to vector<128x384xbf16>
    %cst = arith.constant dense<0.000000e+00> : vector<8x384xf32>
    %7 = tpu.matmul %4, %6, %cst {dimension_numbers = #tpu.dot_dimension_numbers<[1], [0], [0], [1], [0, 0, 1, 1], [], []>} : vector<8x128xbf16>, vector<128x384xbf16>, vector<8x384xf32> -> vector<8x384xf32>
    %c0_5 = arith.constant 0 : index
    %c0_6 = arith.constant 0 : index
    %c0_7 = arith.constant 0 : index
    %8 = vector.load %arg6[%c0_5, %c0_6, %c0_7] : memref<1x1x384xf32, #tpu.memory_space<vmem>>, vector<1x1x384xf32>
    %9 = vector.shape_cast %8 : vector<1x1x384xf32> to vector<1x384xf32>
    %10 = vector.broadcast %9 : vector<1x384xf32> to vector<8x384xf32>
    %11 = arith.addf %7, %10 : vector<8x384xf32>
    %12 = vector.extract_strided_slice %11 {offsets = [0, 0], sizes = [8, 128], strides = [1, 1]} : vector<8x384xf32> to vector<8x128xf32>
    %13 = vector.shape_cast %12 : vector<8x128xf32> to vector<8x2x64xf32>
    %14 = tpu.transpose %13, [1, 0, 2] : vector<8x2x64xf32> -> vector<2x8x64xf32>
    %15 = vector.extract_strided_slice %11 {offsets = [0, 128], sizes = [8, 128], strides = [1, 1]} : vector<8x384xf32> to vector<8x128xf32>
    %16 = vector.shape_cast %15 : vector<8x128xf32> to vector<8x2x64xf32>
    %17 = tpu.transpose %16, [1, 0, 2] : vector<8x2x64xf32> -> vector<2x8x64xf32>
    %18 = vector.extract_strided_slice %11 {offsets = [0, 256], sizes = [8, 128], strides = [1, 1]} : vector<8x384xf32> to vector<8x128xf32>
    %19 = vector.shape_cast %18 : vector<8x128xf32> to vector<8x2x64xf32>
    %20 = tpu.transpose %19, [1, 0, 2] : vector<8x2x64xf32> -> vector<2x8x64xf32>
    %21 = arith.truncf %14 : vector<2x8x64xf32> to vector<2x8x64xbf16>
    %22 = arith.truncf %17 : vector<2x8x64xf32> to vector<2x8x64xbf16>
    "tpu.trace_start"() <{level = 10 : i32, message = "hqd,hkd->hqk"}> : () -> ()
    %cst_8 = arith.constant dense<0.000000e+00> : vector<2x8x8xf32>
    %23 = tpu.matmul %21, %22, %cst_8 {dimension_numbers = #tpu.dot_dimension_numbers<[2], [2], [1], [1], [0, 0, 0, 1, 1, 1], [0], [0]>} : vector<2x8x64xbf16>, vector<2x8x64xbf16>, vector<2x8x8xf32> -> vector<2x8x8xf32>
    "tpu.trace_stop"() : () -> ()
    %cst_9 = arith.constant dense<0xFF800000> : vector<2x8xf32>
    %24 = vector.multi_reduction <maximumf>, %23, %cst_9 [2] : vector<2x8x8xf32> to vector<2x8xf32>
    %25 = vector.shape_cast %24 : vector<2x8xf32> to vector<2x8x1xf32>
    %26 = vector.broadcast %25 : vector<2x8x1xf32> to vector<2x8x8xf32>
    %27 = arith.subf %23, %26 : vector<2x8x8xf32>
    %28 = math.exp %27 : vector<2x8x8xf32>
    %cst_10 = arith.constant dense<0.000000e+00> : vector<2x8xf32>
    %29 = vector.multi_reduction <add>, %28, %cst_10 [2] : vector<2x8x8xf32> to vector<2x8xf32>
    %30 = vector.shape_cast %29 : vector<2x8xf32> to vector<2x8x1xf32>
    %31 = tpu.reciprocal %30 {approx = true} : vector<2x8x1xf32> -> vector<2x8x1xf32>
    %32 = vector.broadcast %31 : vector<2x8x1xf32> to vector<2x8x8xf32>
    %33 = arith.mulf %28, %32 : vector<2x8x8xf32>
    %34 = arith.truncf %33 : vector<2x8x8xf32> to vector<2x8x8xbf16>
    %35 = arith.truncf %20 : vector<2x8x64xf32> to vector<2x8x64xbf16>
    "tpu.trace_start"() <{level = 10 : i32, message = "hqk,hkd->hqd"}> : () -> ()
    %cst_11 = arith.constant dense<0.000000e+00> : vector<2x8x64xf32>
    %36 = tpu.matmul %34, %35, %cst_11 {dimension_numbers = #tpu.dot_dimension_numbers<[2], [1], [1], [2], [0, 0, 0, 1, 1, 2], [0], [0]>} : vector<2x8x8xbf16>, vector<2x8x64xbf16>, vector<2x8x64xf32> -> vector<2x8x64xf32>
    "tpu.trace_stop"() : () -> ()
    %37 = tpu.transpose %36, [1, 0, 2] : vector<2x8x64xf32> -> vector<8x2x64xf32>
    %38 = vector.shape_cast %37 : vector<8x2x64xf32> to vector<8x128xf32>
    %39 = arith.truncf %38 : vector<8x128xf32> to vector<8x128xbf16>
    %c0_12 = arith.constant 0 : index
    %c0_13 = arith.constant 0 : index
    %c0_14 = arith.constant 0 : index
    %40 = vector.load %arg7[%c0_12, %c0_13, %c0_14] : memref<1x128x128xbf16, #tpu.memory_space<vmem>>, vector<1x128x128xbf16>
    %41 = vector.shape_cast %40 : vector<1x128x128xbf16> to vector<128x128xbf16>
    %cst_15 = arith.constant dense<0.000000e+00> : vector<8x128xf32>
    %42 = tpu.matmul %39, %41, %cst_15 {dimension_numbers = #tpu.dot_dimension_numbers<[1], [0], [0], [1], [0, 0, 1, 1], [], []>} : vector<8x128xbf16>, vector<128x128xbf16>, vector<8x128xf32> -> vector<8x128xf32>
    %c0_16 = arith.constant 0 : index
    %c0_17 = arith.constant 0 : index
    %c0_18 = arith.constant 0 : index
    %43 = vector.load %arg8[%c0_16, %c0_17, %c0_18] : memref<1x1x128xf32, #tpu.memory_space<vmem>>, vector<1x1x128xf32>
    %44 = vector.shape_cast %43 : vector<1x1x128xf32> to vector<1x128xf32>
    %45 = vector.broadcast %44 : vector<1x128xf32> to vector<8x128xf32>
    %46 = arith.addf %42, %45 : vector<8x128xf32>
    %47 = arith.addf %3, %46 : vector<8x128xf32>
    %c0_19 = arith.constant 0 : index
    %c0_20 = arith.constant 0 : index
    %c0_21 = arith.constant 0 : index
    %48 = vector.load %arg9[%c0_19, %c0_20, %c0_21] : memref<1x1x128xf32, #tpu.memory_space<vmem>>, vector<1x1x128xf32>
    %49 = vector.shape_cast %48 : vector<1x1x128xf32> to vector<1x128xf32>
    %c0_22 = arith.constant 0 : index
    %c0_23 = arith.constant 0 : index
    %c0_24 = arith.constant 0 : index
    %50 = vector.load %arg10[%c0_22, %c0_23, %c0_24] : memref<1x1x128xf32, #tpu.memory_space<vmem>>, vector<1x1x128xf32>
    %51 = vector.shape_cast %50 : vector<1x1x128xf32> to vector<1x128xf32>
    %cst_25 = arith.constant dense<0.000000e+00> : vector<8xf32>
    %52 = vector.multi_reduction <add>, %47, %cst_25 [1] : vector<8x128xf32> to vector<8xf32>
    %53 = vector.shape_cast %52 : vector<8xf32> to vector<8x1xf32>
    %cst_26 = arith.constant 1.280000e+02 : f32
    %54 = vector.broadcast %cst_26 : f32 to vector<8x1xf32>
    %55 = arith.divf %53, %54 : vector<8x1xf32>
    %56 = arith.mulf %47, %47 : vector<8x128xf32>
    %cst_27 = arith.constant dense<0.000000e+00> : vector<8xf32>
    %57 = vector.multi_reduction <add>, %56, %cst_27 [1] : vector<8x128xf32> to vector<8xf32>
    %58 = vector.shape_cast %57 : vector<8xf32> to vector<8x1xf32>
    %cst_28 = arith.constant 1.280000e+02 : f32
    %59 = vector.broadcast %cst_28 : f32 to vector<8x1xf32>
    %60 = arith.divf %58, %59 : vector<8x1xf32>
    %61 = arith.mulf %55, %55 : vector<8x1xf32>
    %62 = arith.subf %60, %61 : vector<8x1xf32>
    %63 = vector.broadcast %55 : vector<8x1xf32> to vector<8x128xf32>
    %64 = arith.subf %47, %63 : vector<8x128xf32>
    %cst_29 = arith.constant 9.99999996E-13 : f32
    %65 = vector.broadcast %cst_29 : f32 to vector<8x1xf32>
    %66 = arith.addf %62, %65 : vector<8x1xf32>
    %67 = math.rsqrt %66 : vector<8x1xf32>
    %68 = vector.broadcast %67 : vector<8x1xf32> to vector<8x128xf32>
    %69 = arith.mulf %64, %68 : vector<8x128xf32>
    %70 = vector.broadcast %49 : vector<1x128xf32> to vector<8x128xf32>
    %71 = arith.mulf %69, %70 : vector<8x128xf32>
    %72 = vector.broadcast %51 : vector<1x128xf32> to vector<8x128xf32>
    %73 = arith.addf %71, %72 : vector<8x128xf32>
    %74 = arith.truncf %73 : vector<8x128xf32> to vector<8x128xbf16>
    %c0_30 = arith.constant 0 : index
    %c0_31 = arith.constant 0 : index
    %c0_32 = arith.constant 0 : index
    %75 = vector.load %arg11[%c0_30, %c0_31, %c0_32] : memref<1x128x512xbf16, #tpu.memory_space<vmem>>, vector<1x128x512xbf16>
    %76 = vector.shape_cast %75 : vector<1x128x512xbf16> to vector<128x512xbf16>
    %cst_33 = arith.constant dense<0.000000e+00> : vector<8x512xf32>
    %77 = tpu.matmul %74, %76, %cst_33 {dimension_numbers = #tpu.dot_dimension_numbers<[1], [0], [0], [1], [0, 0, 1, 1], [], []>} : vector<8x128xbf16>, vector<128x512xbf16>, vector<8x512xf32> -> vector<8x512xf32>
    %c0_34 = arith.constant 0 : index
    %c0_35 = arith.constant 0 : index
    %c0_36 = arith.constant 0 : index
    %78 = vector.load %arg12[%c0_34, %c0_35, %c0_36] : memref<1x1x512xf32, #tpu.memory_space<vmem>>, vector<1x1x512xf32>
    %79 = vector.shape_cast %78 : vector<1x1x512xf32> to vector<1x512xf32>
    %80 = vector.broadcast %79 : vector<1x512xf32> to vector<8x512xf32>
    %81 = arith.addf %77, %80 : vector<8x512xf32>
    %cst_37 = arith.constant 5.000000e-01 : f32
    %82 = vector.broadcast %cst_37 : f32 to vector<8x512xf32>
    %83 = arith.mulf %82, %81 : vector<8x512xf32>
    %cst_38 = arith.constant 4.471500e-02 : f32
    %84 = vector.broadcast %cst_38 : f32 to vector<8x512xf32>
    %85 = arith.mulf %84, %81 : vector<8x512xf32>
    %86 = arith.mulf %85, %81 : vector<8x512xf32>
    %87 = arith.mulf %86, %81 : vector<8x512xf32>
    %88 = arith.addf %81, %87 : vector<8x512xf32>
    %cst_39 = arith.constant 0.797884583 : f32
    %89 = vector.broadcast %cst_39 : f32 to vector<8x512xf32>
    %90 = arith.mulf %89, %88 : vector<8x512xf32>
    %91 = math.tanh %90 : vector<8x512xf32>
    %cst_40 = arith.constant 1.000000e+00 : f32
    %92 = vector.broadcast %cst_40 : f32 to vector<8x512xf32>
    %93 = arith.addf %92, %91 : vector<8x512xf32>
    %94 = arith.mulf %83, %93 : vector<8x512xf32>
    %95 = arith.truncf %94 : vector<8x512xf32> to vector<8x512xbf16>
    %c0_41 = arith.constant 0 : index
    %c0_42 = arith.constant 0 : index
    %c0_43 = arith.constant 0 : index
    %96 = vector.load %arg13[%c0_41, %c0_42, %c0_43] : memref<1x512x128xbf16, #tpu.memory_space<vmem>>, vector<1x512x128xbf16>
    %97 = vector.shape_cast %96 : vector<1x512x128xbf16> to vector<512x128xbf16>
    %cst_44 = arith.constant dense<0.000000e+00> : vector<8x128xf32>
    %98 = tpu.matmul %95, %97, %cst_44 {dimension_numbers = #tpu.dot_dimension_numbers<[1], [0], [0], [1], [0, 0, 1, 1], [], []>} : vector<8x512xbf16>, vector<512x128xbf16>, vector<8x128xf32> -> vector<8x128xf32>
    %c0_45 = arith.constant 0 : index
    %c0_46 = arith.constant 0 : index
    %c0_47 = arith.constant 0 : index
    %99 = vector.load %arg14[%c0_45, %c0_46, %c0_47] : memref<1x1x128xf32, #tpu.memory_space<vmem>>, vector<1x1x128xf32>
    %100 = vector.shape_cast %99 : vector<1x1x128xf32> to vector<1x128xf32>
    %101 = vector.broadcast %100 : vector<1x128xf32> to vector<8x128xf32>
    %102 = arith.addf %98, %101 : vector<8x128xf32>
    %103 = arith.addf %73, %102 : vector<8x128xf32>
    %c0_48 = arith.constant 0 : index
    %c0_49 = arith.constant 0 : index
    %c0_50 = arith.constant 0 : index
    %104 = vector.load %arg15[%c0_48, %c0_49, %c0_50] : memref<1x1x128xf32, #tpu.memory_space<vmem>>, vector<1x1x128xf32>
    %105 = vector.shape_cast %104 : vector<1x1x128xf32> to vector<1x128xf32>
    %c0_51 = arith.constant 0 : index
    %c0_52 = arith.constant 0 : index
    %c0_53 = arith.constant 0 : index
    %106 = vector.load %arg16[%c0_51, %c0_52, %c0_53] : memref<1x1x128xf32, #tpu.memory_space<vmem>>, vector<1x1x128xf32>
    %107 = vector.shape_cast %106 : vector<1x1x128xf32> to vector<1x128xf32>
    %cst_54 = arith.constant dense<0.000000e+00> : vector<8xf32>
    %108 = vector.multi_reduction <add>, %103, %cst_54 [1] : vector<8x128xf32> to vector<8xf32>
    %109 = vector.shape_cast %108 : vector<8xf32> to vector<8x1xf32>
    %cst_55 = arith.constant 1.280000e+02 : f32
    %110 = vector.broadcast %cst_55 : f32 to vector<8x1xf32>
    %111 = arith.divf %109, %110 : vector<8x1xf32>
    %112 = arith.mulf %103, %103 : vector<8x128xf32>
    %cst_56 = arith.constant dense<0.000000e+00> : vector<8xf32>
    %113 = vector.multi_reduction <add>, %112, %cst_56 [1] : vector<8x128xf32> to vector<8xf32>
    %114 = vector.shape_cast %113 : vector<8xf32> to vector<8x1xf32>
    %cst_57 = arith.constant 1.280000e+02 : f32
    %115 = vector.broadcast %cst_57 : f32 to vector<8x1xf32>
    %116 = arith.divf %114, %115 : vector<8x1xf32>
    %117 = arith.mulf %111, %111 : vector<8x1xf32>
    %118 = arith.subf %116, %117 : vector<8x1xf32>
    %119 = vector.broadcast %111 : vector<8x1xf32> to vector<8x128xf32>
    %120 = arith.subf %103, %119 : vector<8x128xf32>
    %cst_58 = arith.constant 9.99999996E-13 : f32
    %121 = vector.broadcast %cst_58 : f32 to vector<8x1xf32>
    %122 = arith.addf %118, %121 : vector<8x1xf32>
    %123 = math.rsqrt %122 : vector<8x1xf32>
    %124 = vector.broadcast %123 : vector<8x1xf32> to vector<8x128xf32>
    %125 = arith.mulf %120, %124 : vector<8x128xf32>
    %126 = vector.broadcast %105 : vector<1x128xf32> to vector<8x128xf32>
    %127 = arith.mulf %125, %126 : vector<8x128xf32>
    %128 = vector.broadcast %107 : vector<1x128xf32> to vector<8x128xf32>
    %129 = arith.addf %127, %128 : vector<8x128xf32>
    %c0_59 = arith.constant 0 : index
    %c0_60 = arith.constant 0 : index
    %130 = vector.load %arg24[%c0_59, %c0_60] : memref<8x128xf32, #tpu.memory_space<vmem>>, vector<8x128xf32>
    tpu.vector_store %arg24[%c0_59, %c0_60], %129 {strides = array<i32>} : memref<8x128xf32, #tpu.memory_space<vmem>>, vector<8x128xf32>,
    %c1_i32 = arith.constant 1 : i32
    %131 = arith.cmpi eq, %arg1, %c1_i32 : i32
    %132 = arith.extui %131 : i1 to i32
    %c0_i32_61 = arith.constant 0 : i32
    %133 = arith.cmpi ne, %132, %c0_i32_61 : i32
    scf.if %133 {
      %134 = arith.truncf %129 : vector<8x128xf32> to vector<8x128xbf16>
      %c0_62 = arith.constant 0 : index
      %c0_63 = arith.constant 0 : index
      %135 = vector.load %arg17[%c0_62, %c0_63] : memref<128x128xbf16, #tpu.memory_space<vmem>>, vector<128x128xbf16>
      %cst_64 = arith.constant dense<0.000000e+00> : vector<8x128xf32>
      %136 = tpu.matmul %134, %135, %cst_64 {dimension_numbers = #tpu.dot_dimension_numbers<[1], [0], [0], [1], [0, 0, 1, 1], [], []>} : vector<8x128xbf16>, vector<128x128xbf16>, vector<8x128xf32> -> vector<8x128xf32>
      %c0_65 = arith.constant 0 : index
      %c0_66 = arith.constant 0 : index
      %137 = vector.load %arg18[%c0_65, %c0_66] : memref<1x128xf32, #tpu.memory_space<vmem>>, vector<1x128xf32>
      %138 = vector.broadcast %137 : vector<1x128xf32> to vector<8x128xf32>
      %139 = arith.addf %136, %138 : vector<8x128xf32>
      %140 = math.tanh %139 : vector<8x128xf32>
      %141 = arith.truncf %140 : vector<8x128xf32> to vector<8x128xbf16>
      %c0_67 = arith.constant 0 : index
      %c0_68 = arith.constant 0 : index
      %142 = vector.load %arg19[%c0_67, %c0_68] : memref<128x256xbf16, #tpu.memory_space<vmem>>, vector<128x256xbf16>
      %cst_69 = arith.constant dense<0.000000e+00> : vector<8x256xf32>
      %143 = tpu.matmul %141, %142, %cst_69 {dimension_numbers = #tpu.dot_dimension_numbers<[1], [0], [0], [1], [0, 0, 1, 1], [], []>} : vector<8x128xbf16>, vector<128x256xbf16>, vector<8x256xf32> -> vector<8x256xf32>
      %c0_70 = arith.constant 0 : index
      %c0_71 = arith.constant 0 : index
      %144 = vector.load %arg20[%c0_70, %c0_71] : memref<1x256xf32, #tpu.memory_space<vmem>>, vector<1x256xf32>
      %145 = vector.broadcast %144 : vector<1x256xf32> to vector<8x256xf32>
      %146 = arith.addf %143, %145 : vector<8x256xf32>
      %cst_72 = arith.constant 0.000000e+00 : f32
      %147 = vector.broadcast %cst_72 : f32 to vector<8x256xf32>
      %148 = arith.maximumf %146, %147 : vector<8x256xf32>
      %149 = arith.truncf %148 : vector<8x256xf32> to vector<8x256xbf16>
      %c0_73 = arith.constant 0 : index
      %c0_74 = arith.constant 0 : index
      %150 = vector.load %arg21[%c0_73, %c0_74] : memref<256x128xbf16, #tpu.memory_space<vmem>>, vector<256x128xbf16>
      %cst_75 = arith.constant dense<0.000000e+00> : vector<8x128xf32>
      %151 = tpu.matmul %149, %150, %cst_75 {dimension_numbers = #tpu.dot_dimension_numbers<[1], [0], [0], [1], [0, 0, 1, 1], [], []>} : vector<8x256xbf16>, vector<256x128xbf16>, vector<8x128xf32> -> vector<8x128xf32>
      %c0_76 = arith.constant 0 : index
      %c0_77 = arith.constant 0 : index
      %152 = vector.load %arg22[%c0_76, %c0_77] : memref<1x128xf32, #tpu.memory_space<vmem>>, vector<1x128xf32>
      %153 = vector.broadcast %152 : vector<1x128xf32> to vector<8x128xf32>
      %154 = arith.addf %151, %153 : vector<8x128xf32>
      %c0_78 = arith.constant 0 : index
      %c0_79 = arith.constant 0 : index
      %c0_80 = arith.constant 0 : index
      %155 = vector.load %arg23[%c0_78, %c0_79, %c0_80] : memref<1x8x128xf32, #tpu.memory_space<vmem>>, vector<1x8x128xf32>
      %156 = vector.shape_cast %155 : vector<1x8x128xf32> to vector<8x128xf32>
      %157 = vector.shape_cast %154 : vector<8x128xf32> to vector<1x8x128xf32>
      tpu.vector_store %arg23[%c0_78, %c0_79, %c0_80], %157 {strides = array<i32>} : memref<1x8x128xf32, #tpu.memory_space<vmem>>, vector<1x8x128xf32>,
    } else {
    }
    return
  }
  func.func @transform_0(%arg0: i32, %arg1: i32) -> (i32, i32, i32) {
    %c0_i32 = arith.constant 0 : i32
    %c0_i32_0 = arith.constant 0 : i32
    %c0_i32_1 = arith.constant 0 : i32
    return %arg0, %c0_i32, %c0_i32_0 : i32, i32, i32
  }
  func.func @transform_1(%arg0: i32, %arg1: i32) -> (i32, i32) {
    %c0_i32 = arith.constant 0 : i32
    %c0_i32_0 = arith.constant 0 : i32
    %c0_i32_1 = arith.constant 0 : i32
    return %c0_i32, %c0_i32_0 : i32, i32
  }
  func.func @transform_2(%arg0: i32, %arg1: i32) -> (i32, i32) {
    %c0_i32 = arith.constant 0 : i32
    %c0_i32_0 = arith.constant 0 : i32
    %c0_i32_1 = arith.constant 0 : i32
    return %c0_i32, %c0_i32_0 : i32, i32
  }
  func.func @transform_3(%arg0: i32, %arg1: i32) -> (i32, i32, i32) {
    %c0_i32 = arith.constant 0 : i32
    %c0_i32_0 = arith.constant 0 : i32
    %c0_i32_1 = arith.constant 0 : i32
    return %arg1, %c0_i32, %c0_i32_0 : i32, i32, i32
  }
  func.func @transform_4(%arg0: i32, %arg1: i32) -> (i32, i32, i32) {
    %c0_i32 = arith.constant 0 : i32
    %c0_i32_0 = arith.constant 0 : i32
    %c0_i32_1 = arith.constant 0 : i32
    return %arg1, %c0_i32, %c0_i32_0 : i32, i32, i32
  }
  func.func @transform_5(%arg0: i32, %arg1: i32) -> (i32, i32, i32) {
    %c0_i32 = arith.constant 0 : i32
    %c0_i32_0 = arith.constant 0 : i32
    %c0_i32_1 = arith.constant 0 : i32
    return %arg1, %c0_i32, %c0_i32_0 : i32, i32, i32
  }
  func.func @transform_6(%arg0: i32, %arg1: i32) -> (i32, i32, i32) {
    %c0_i32 = arith.constant 0 : i32
    %c0_i32_0 = arith.constant 0 : i32
    %c0_i32_1 = arith.constant 0 : i32
    return %arg1, %c0_i32, %c0_i32_0 : i32, i32, i32
  }
  func.func @transform_7(%arg0: i32, %arg1: i32) -> (i32, i32, i32) {
    %c0_i32 = arith.constant 0 : i32
    %c0_i32_0 = arith.constant 0 : i32
    %c0_i32_1 = arith.constant 0 : i32
    return %arg1, %c0_i32, %c0_i32_0 : i32, i32, i32
  }
  func.func @transform_8(%arg0: i32, %arg1: i32) -> (i32, i32, i32) {
    %c0_i32 = arith.constant 0 : i32
    %c0_i32_0 = arith.constant 0 : i32
    %c0_i32_1 = arith.constant 0 : i32
    return %arg1, %c0_i32, %c0_i32_0 : i32, i32, i32
  }
  func.func @transform_9(%arg0: i32, %arg1: i32) -> (i32, i32, i32) {
    %c0_i32 = arith.constant 0 : i32
    %c0_i32_0 = arith.constant 0 : i32
    %c0_i32_1 = arith.constant 0 : i32
    return %arg1, %c0_i32, %c0_i32_0 : i32, i32, i32
  }
  func.func @transform_10(%arg0: i32, %arg1: i32) -> (i32, i32, i32) {
    %c0_i32 = arith.constant 0 : i32
    %c0_i32_0 = arith.constant 0 : i32
    %c0_i32_1 = arith.constant 0 : i32
    return %arg1, %c0_i32, %c0_i32_0 : i32, i32, i32
  }
  func.func @transform_11(%arg0: i32, %arg1: i32) -> (i32, i32, i32) {
    %c0_i32 = arith.constant 0 : i32
    %c0_i32_0 = arith.constant 0 : i32
    %c0_i32_1 = arith.constant 0 : i32
    return %arg1, %c0_i32, %c0_i32_0 : i32, i32, i32
  }
  func.func @transform_12(%arg0: i32, %arg1: i32) -> (i32, i32, i32) {
    %c0_i32 = arith.constant 0 : i32
    %c0_i32_0 = arith.constant 0 : i32
    %c0_i32_1 = arith.constant 0 : i32
    return %arg1, %c0_i32, %c0_i32_0 : i32, i32, i32
  }
  func.func @transform_13(%arg0: i32, %arg1: i32) -> (i32, i32, i32) {
    %c0_i32 = arith.constant 0 : i32
    %c0_i32_0 = arith.constant 0 : i32
    %c0_i32_1 = arith.constant 0 : i32
    return %arg1, %c0_i32, %c0_i32_0 : i32, i32, i32
  }
  func.func @transform_14(%arg0: i32, %arg1: i32) -> (i32, i32, i32) {
    %c0_i32 = arith.constant 0 : i32
    %c0_i32_0 = arith.constant 0 : i32
    %c0_i32_1 = arith.constant 0 : i32
    return %arg1, %c0_i32, %c0_i32_0 : i32, i32, i32
  }
  func.func @transform_15(%arg0: i32, %arg1: i32) -> (i32, i32) {
    %c0_i32 = arith.constant 0 : i32
    %c0_i32_0 = arith.constant 0 : i32
    %c0_i32_1 = arith.constant 0 : i32
    return %c0_i32, %c0_i32_0 : i32, i32
  }
  func.func @transform_16(%arg0: i32, %arg1: i32) -> (i32, i32) {
    %c0_i32 = arith.constant 0 : i32
    %c0_i32_0 = arith.constant 0 : i32
    %c0_i32_1 = arith.constant 0 : i32
    return %c0_i32, %c0_i32_0 : i32, i32
  }
  func.func @transform_17(%arg0: i32, %arg1: i32) -> (i32, i32) {
    %c0_i32 = arith.constant 0 : i32
    %c0_i32_0 = arith.constant 0 : i32
    %c0_i32_1 = arith.constant 0 : i32
    return %c0_i32, %c0_i32_0 : i32, i32
  }
  func.func @transform_18(%arg0: i32, %arg1: i32) -> (i32, i32) {
    %c0_i32 = arith.constant 0 : i32
    %c0_i32_0 = arith.constant 0 : i32
    %c0_i32_1 = arith.constant 0 : i32
    return %c0_i32, %c0_i32_0 : i32, i32
  }
  func.func @transform_19(%arg0: i32, %arg1: i32) -> (i32, i32) {
    %c0_i32 = arith.constant 0 : i32
    %c0_i32_0 = arith.constant 0 : i32
    %c0_i32_1 = arith.constant 0 : i32
    return %c0_i32, %c0_i32_0 : i32, i32
  }
  func.func @transform_20(%arg0: i32, %arg1: i32) -> (i32, i32) {
    %c0_i32 = arith.constant 0 : i32
    %c0_i32_0 = arith.constant 0 : i32
    %c0_i32_1 = arith.constant 0 : i32
    return %c0_i32, %c0_i32_0 : i32, i32
  }
  func.func @transform_21(%arg0: i32, %arg1: i32) -> (i32, i32, i32) {
    %c0_i32 = arith.constant 0 : i32
    %c0_i32_0 = arith.constant 0 : i32
    %c0_i32_1 = arith.constant 0 : i32
    return %arg0, %c0_i32, %c0_i32_0 : i32, i32, i32
  }
}

</mosaic_0001>

<bundles_post_ra>
// kernel: pure_bert_forward.1
= control target key start
LH: loop header
LB: loop body
LE: loop exit
PB: predicated region body
PF: predicated region fallthrough
CT: control target
= control target key end

     0   :  { %s3884_s25 = smov 0   ;;  %s3886_s26 = smov 0   ;;  %s4561_s0 = inlined_call_operand.vmem [shape: f32[2,8,128], index: 0, kind: input, shape index: {}]   ;;  %s4562_s1 = inlined_call_operand.vmem [shape: f32[1,128], index: 1, kind: input, shape index: {}]   ;;  %s4563_s2 = inlined_call_operand.vmem [shape: f32[1,128], index: 2, kind: input, shape index: {}]   ;;  %s4564_s3 = inlined_call_operand.vmem [shape: bf16[2,128,384], index: 3, kind: input, shape index: {}]   ;;  %s4565_s4 = inlined_call_operand.vmem [shape: f32[2,1,384], index: 4, kind: input, shape index: {}]   ;;  %s4566_s5 = inlined_call_operand.vmem [shape: bf16[2,128,128], index: 5, kind: input, shape index: {}]   ;;  %s4567_s6 = inlined_call_operand.vmem [shape: f32[2,1,128], index: 6, kind: input, shape index: {}]   ;;  %s4568_s7 = inlined_call_operand.vmem [shape: f32[2,1,128], index: 7, kind: input, shape index: {}]   ;;  %s4569_s8 = inlined_call_operand.vmem [shape: f32[2,1,128], index: 8, kind: input, shape index: {}]   ;;  %s4570_s9 = inlined_call_operand.vmem [shape: bf16[2,128,512], index: 9, kind: input, shape index: {}]   ;;  %s4571_s10 = inlined_call_operand.vmem [shape: f32[2,1,512], index: 10, kind: input, shape index: {}]   ;;  %s4572_s11 = inlined_call_operand.vmem [shape: bf16[2,512,128], index: 11, kind: input, shape index: {}]   ;;  %s4573_s12 = inlined_call_operand.vmem [shape: f32[2,1,128], index: 12, kind: input, shape index: {}]   ;;  %s4574_s13 = inlined_call_operand.vmem [shape: f32[2,1,128], index: 13, kind: input, shape index: {}]   ;;  %s4575_s14 = inlined_call_operand.vmem [shape: f32[2,1,128], index: 14, kind: input, shape index: {}]   ;;  %s4576_s15 = inlined_call_operand.vmem [shape: bf16[128,128], index: 15, kind: input, shape index: {}]   ;;  %s4577_s16 = inlined_call_operand.vmem [shape: f32[1,128], index: 16, kind: input, shape index: {}]   ;;  %s4578_s17 = inlined_call_operand.vmem [shape: bf16[128,256], index: 17, kind: input, shape index: {}]   ;;  %s4579_s18 = inlined_call_operand.vmem [shape: f32[1,256], index: 18, kind: input, shape index: {}]   ;;  %s4580_s19 = inlined_call_operand.vmem [shape: bf16[256,128], index: 19, kind: input, shape index: {}]   ;;  %s4581_s20 = inlined_call_operand.vmem [shape: f32[1,128], index: 20, kind: input, shape index: {}]   ;;  %s4582_s21 = inlined_call_operand.vmem [shape: f32[2,8,128], index: 21, kind: output, shape index: {}]  }
   0x1   :  { %4590 = sst [smem:[#allocation9_spill]] %s4561_s0  ;;  %s3888_s27 = smov 0  }
   0x2   :  { %4591 = sst [smem:[#allocation10_spill]] %s4562_s1 }
   0x3   :  { %4592 = sst [smem:[#allocation11_spill]] %s4563_s2  ;;  %s3882_s2 = smov 0  }
   0x4   :  { %4593 = sst [smem:[#allocation12_spill]] %s4564_s3  ;;  %s3890_s3 = smov 0  }
   0x5   :  { %4594 = sst [smem:[#allocation13_spill]] %s4565_s4 }
   0x6   :  { %4595 = sst [smem:[#allocation14_spill]] %s4566_s5 }
   0x7   :  { %4596 = sst [smem:[#allocation15_spill]] %s4569_s8 }
   0x8   :  { %4597 = sst [smem:[#allocation16_spill]] %s4570_s9 }
   0x9   :  { %4598 = sst [smem:[#allocation17_spill]] %s4571_s10 }
   0xa   :  { %4599 = sst [smem:[#allocation18_spill]] %s4575_s14 }
   0xb   :  { %4600 = sst [smem:[#allocation19_spill]] %s4576_s15 }
   0xc   :  { %4601 = sst [smem:[#allocation20_spill]] %s4577_s16 }
   0xd   :  { %4602 = sst [smem:[#allocation21_spill]] %s4578_s17 }
   0xe   :  { %4603 = sst [smem:[#allocation22_spill]] %s4579_s18 }
   0xf   :  { %4604 = sst [smem:[#allocation23_spill]] %s4580_s19 }
  0x10   :  { %4605 = sst [smem:[#allocation24_spill]] %s4581_s20 }
  0x11   :  { %4606 = sst [smem:[#allocation25_spill]] %s4582_s21 }
  0x12 LB: > { %4607 = sst [smem:[#allocation3_spill]] %s3749_s2  ;;  %s40_s28 = sadd.s32 1, %s3757_s26  ;;  %s3765_s3 = sphi %s3890_s3, %s31_s3   ;;  %s3761_s27 = sphi %s3888_s27, %s4641_s27   ;;  %s3757_s26 = sphi %s3886_s26, %s4640_s26   ;;  %s3753_s25 = sphi %s3884_s25, %s4639_s25   ;;  %s3749_s2 = sphi %s3882_s2, %s4638_s2  }
  0x13   : > { %4608 = sst [smem:[#allocation4_spill]] %s3757_s26  ;;  %s43_s29 = sadd.s32 1, %s3761_s27 }
  0x14   : > { %4609 = sst [smem:[#allocation5_spill]] %s3761_s27  ;;  %p41_p0 = scmp.ge.s32.totalorder %s40_s28, 2 }
  0x15   : > { %4610 = sst [smem:[#allocation6_spill]] %s3765_s3  ;;  %p2940_p1 = scmp.ge.s32.totalorder %s3765_s3, 1 }
  0x16   : > { %p704_p2 = scmp.lt.s32.totalorder %s3765_s3, 5  ;;  %s4643_s28 = smov (%p41_p0, %s40_s28), 0 }
  0x17   : > { %4611 = sst [smem:[#allocation7_spill]] %s4643_s28  ;;  %s4645_s29 = smov (!%p41_p0, %s43_s29), %s3761_s27 }
  0x18   : > { %p705_p3 = pnand %p2940_p1, %p704_p2  ;;  %p45_p4 = scmp.ge.s32.totalorder %s4645_s29, 2 }
  0x19   : > { %p808_p5 = scmp.lt.s32.totalorder (!%p705_p3), %s3753_s25, 1  ;;  %p812_p6 = scmp.lt.s32.totalorder (!%p705_p3), %s3749_s2, 1 }
  0x1a   : > { %s4647_s29 = smov (%p45_p4, %s4645_s29), 0  ;;  %708 = sbr.rel (%p705_p3) target bundleno = 2364 (0x93c), region = 104 }
  0x1b   : > { %4612 = sst [smem:[#allocation8_spill]] %s4647_s29 }
  0x1c   : > { %s4613_s22 = sld [smem:[#allocation9_spill]] (!%p705_p3) }
  0x1d   : > { %s4614_s26 = sld [smem:[#allocation12_spill]] (!%p705_p3) }
  0x1e   : > { %s4615_s16 = sld [smem:[#allocation14_spill]] (!%p705_p3) }
  0x1f   : > { %s4649_s25 = smov (!%p808_p5, %s3753_s25), 1  ;;  %s4616_s30 = sld [smem:[#allocation13_spill]] }
  0x20   : > { %s3916_s0 = scalar_select %p812_p6, %s3749_s2, 1 }
  0x21   : > { %s2941_s4 = sshll.u32 %s4649_s25, 3  ;;  %s4618_s9 = sld [smem:[#allocation16_spill]] }
  0x22   : > { %s811_s23 = scalar_lea.vmem %s4613_s22, %s2941_s4  ;;  %s3642_s1 = smul.u32 192, %s3916_s0 }
  0x23   : > { %s3643_s24 = smul.u32 3, %s3916_s0  ;;  %s3503_s29 = sshll.u32 %s3916_s0, 6 }
  0x24   : > { %s3927_s3 = scalar_lea.vmem %s4614_s26, %s3642_s1  ;;  %s3932_s19 = scalar_lea.vmem %s4615_s16, %s3503_s29 }
  0x25   : > { %s3937_s5 = scalar_lea.vmem %s4616_s30, %s3643_s24  ;;  %s3504_s18 = sshll.u32 %s3916_s0, 8 }
  0x26   : > { %s2947_s16 = sshll.u32 %s3916_s0, 2  ;;  %s4619_s10 = sld [smem:[#allocation17_spill]] }
  0x27   : > { %s3956_s17 = scalar_lea.vmem %s4618_s9, %s3504_s18  ;;  %s3966_s14 = scalar_lea.vmem %s4572_s11, %s3504_s18 }
  0x28   : > { %s851_s28 = scalar_lea.vmem %s4573_s12, %s3916_s0  ;;  %s854_s20 = scalar_lea.vmem %s4574_s13, %s3916_s0 }
  0x29   : > { %s4620_s9 = sld [smem:[#allocation18_spill]] }
  0x2a   : > { %s4621_s25 = sld [smem:[#allocation25_spill]] }
  0x2b   : > { %s4622_s30 = sld [smem:[#allocation3_spill]] }
  0x2c   : > { %s3961_s15 = scalar_lea.vmem %s4619_s10, %s2947_s16 }
  0x2f   : > { %s857_s8 = scalar_lea.vmem %s4620_s9, %s3916_s0 }
  0x30   : > { %s3983_s10 = scalar_lea.vmem %s4621_s25, %s2941_s4 }
  0x31   : > { %p2951_p7 = scmp.ne.s32.totalorder %s4622_s30, 0 }
  0x32   : > { %s4623_s4 = sld [smem:[#allocation10_spill]] (!%p2951_p7) }
  0x33   : > { %866 = sbr.rel (%p2951_p7) target bundleno = 212 (0xd4), region = 108  ;;  %s4624_s1 = sld [smem:[#allocation11_spill]] (!%p2951_p7) }
  0x38   : > { %v867_v0 = vld [vmem:[%s811_s23] sm:$0xff]  ;;  %v3767_v2 = vmov 128.0  }
  0x39   : > { %870 = vadd.xlane.f32.xlu0 %v867_v0  ;;  %v880_v1 = vmul.f32 %v867_v0, %v867_v0  ;;  %3691 = vrcp.f32 %v3767_v2  ;;  %v3689_v23 = vld [vmem:[%s4623_s4] ss:$0 sm:$0xff] }
  0x3a   : > { %v3690_v25 = vld [vmem:[%s4624_s1] ss:$0 sm:$0xff] }
  0x3f   : > { %v3692_v3 = vpop.eup %3691 }
  0x40   : > { %v873_v4 = vmul.f32 128.0, %v3692_v3  ;;  %vm877_vm0 = vweird.f32 %v3692_v3 }
  0x41   : > { %881 = vadd.xlane.f32.xlu0 %v880_v1 }
  0x42   : > { %v874_v5 = vsub.f32 1.0, %v873_v4 }
  0x44   : > { %v875_v6 = vmul.f32 %v3692_v3, %v874_v5 }
  0x46   : > { %v876_v7 = vadd.f32 %v3692_v3, %v875_v6 }
  0x48   : > { %v878_v9 = vsel %vm877_vm0, %v3692_v3, %v876_v7 }
  0xac   : > { %v871_v8 = vpop.xlane.xlu0 %870 }
  0xad   : > { %v879_v10 = vmul.f32 %v878_v9, %v871_v8 }
  0xaf   : > { %v884_v12 = vmul.f32 %v879_v10, %v879_v10  ;;  %v886_v22 = vsub.f32 %v867_v0, %v879_v10 }
  0xb4   : > { %v882_v11 = vpop.xlane.xlu0 %881 }
  0xb5   : > { %v883_v13 = vmul.f32 %v882_v11, %v878_v9 }
  0xb7   : > { %v885_v14 = vsub.f32 %v883_v13, %v884_v12 }
  0xb9   : > { %v887_v15 = vadd.f32 1e-12, %v885_v14 }
  0xbb   : > { %3693 = vrsqrt.f32 %v887_v15  ;;  %vm894_vm2 = vweird.f32 %v887_v15 }
  0xc1   : > { %v3694_v16 = vpop.eup %3693 }
  0xc2   : > { %v889_v17 = vmul.f32 %v3694_v16, %v887_v15  ;;  %vm895_vm1 = vweird.f32 %v3694_v16 }
  0xc3   : > { %vm896_vm3 = vmor %vm894_vm2, %vm895_vm1 }
  0xc4   : > { %v890_v18 = vmul.f32 %v3694_v16, %v889_v17 }
  0xc6   : > { %v891_v19 = vmul.f32 0.5, %v890_v18 }
  0xc8   : > { %v892_v20 = vsub.f32 1.5, %v891_v19 }
  0xca   : > { %v893_v21 = vmul.f32 %v3694_v16, %v892_v20 }
  0xcc   : > { %v897_v24 = vsel %vm896_vm3, %v3694_v16, %v893_v21 }
  0xcd   : > { %v898_v26 = vmul.f32 %v897_v24, %v886_v22 }
  0xcf   : > { %v902_v27 = vmul.f32 %v3689_v23, %v898_v26 }
  0xd1   : > { %v906_v28 = vadd.f32 %v3690_v25, %v902_v27 }
  0xd3   : > { %907 = vst [vmem:[#allocation2] sm:$0xff] %v906_v28 }
  0xd4 PF: > { %v3038_v29 = vld [vmem:[%s3927_s3 + $0xa8] sm:$0xf]  ;;  %v3528_v30 = vld [vmem:[%s3927_s3 + $0xb0] sm:$0xf0]  ;;  %v3527_v31 = vld [vmem:[%s3927_s3 + $0xac] sm:$0xf]  ;;  %s4625_s22 = scalar_lea.vmem %s4567_s6, %s3916_s0  ;;  %s4626_s21 = scalar_lea.vmem %s4568_s7, %s3916_s0 }
  0xd5   : > { %v3039_v32 = vor.u32 %v3528_v30, %v3038_v29  ;;  %v3040_v33 = vld [vmem:[%s3927_s3 + $0xb4] sm:$0xf0]  ;;  %v3026_v34 = vld [vmem:[%s3927_s3 + $0x90] sm:$0xf]  ;;  %v3525_v35 = vld [vmem:[%s3927_s3 + $0x98] sm:$0xf0] }
  0xd6   : > { %v3043_v36 = vor.u32 %v3527_v31, %v3040_v33  ;;  %v3524_v37 = vld [vmem:[%s3927_s3 + $0x94] sm:$0xf]  ;;  %v3028_v38 = vld [vmem:[%s3927_s3 + $0x9c] sm:$0xf0]  ;;  %v3027_v39 = vor.u32 %v3525_v35, %v3026_v34  ;;  %v3014_v41 = vld [vmem:[%s3927_s3 + $0x78] sm:$0xf] }
  0xd7   : > { %1078 = vmatpush.bf16.msra.mxu0 %v3039_v32  ;;  %v3031_v40 = vor.u32 %v3524_v37, %v3028_v38  ;;  %v3522_v42 = vld [vmem:[%s3927_s3 + $0x80] sm:$0xf0]  ;;  %v3521_v43 = vld [vmem:[%s3927_s3 + $0x7c] sm:$0xf]  ;;  %v3016_v44 = vld [vmem:[%s3927_s3 + $0x84] sm:$0xf0] }
  0xd8   : > { %1091 = vmatpush.bf16.msra.mxu1 %v3043_v36  ;;  %v3015_v45 = vor.u32 %v3522_v42, %v3014_v41  ;;  %v3019_v46 = vor.u32 %v3521_v43, %v3016_v44  ;;  %v3002_v47 = vld [vmem:[%s3927_s3 + $0x60] sm:$0xf]  ;;  %v3519_v48 = vld [vmem:[%s3927_s3 + $0x68] sm:$0xf0]  ;;  %v3518_v49 = vld [vmem:[%s3927_s3 + $0x64] sm:$0xf] }
  0xd9   : > { %v3004_v50 = vld [vmem:[%s3927_s3 + $0x6c] sm:$0xf0]  ;;  %v2990_v51 = vld [vmem:[%s3927_s3 + $0x48] sm:$0xf]  ;;  %v3003_v52 = vor.u32 %v3519_v48, %v3002_v47  ;;  %v3516_v53 = vld [vmem:[%s3927_s3 + $0x50] sm:$0xf0] }
  0xda   : > { %v3007_v54 = vor.u32 %v3518_v49, %v3004_v50  ;;  %v3515_v55 = vld [vmem:[%s3927_s3 + $0x4c] sm:$0xf]  ;;  %v2992_v56 = vld [vmem:[%s3927_s3 + $0x54] sm:$0xf0]  ;;  %v2991_v57 = vor.u32 %v3516_v53, %v2990_v51  ;;  %v2978_v59 = vld [vmem:[%s3927_s3 + $0x30] sm:$0xf] }
  0xdb   : > { %1079 = vmatpush.bf16.msra.mxu0 %v3027_v39  ;;  %v2995_v58 = vor.u32 %v3515_v55, %v2992_v56  ;;  %v3513_v60 = vld [vmem:[%s3927_s3 + $0x38] sm:$0xf0]  ;;  %v3512_v61 = vld [vmem:[%s3927_s3 + $0x34] sm:$0xf]  ;;  %v2980_v62 = vld [vmem:[%s3927_s3 + $0x3c] sm:$0xf0] }
  0xdc   : > { %1092 = vmatpush.bf16.msra.mxu1 %v3031_v40  ;;  %v2979_v63 = vor.u32 %v3513_v60, %v2978_v59  ;;  %v2983_v0 = vor.u32 %v3512_v61, %v2980_v62  ;;  %v2966_v1 = vld [vmem:[%s3927_s3 + $0x18] sm:$0xf]  ;;  %v3510_v2 = vld [vmem:[%s3927_s3 + $0x20] sm:$0xf0]  ;;  %v3509_v3 = vld [vmem:[%s3927_s3 + $0x1c] sm:$0xf] }
  0xdd   : > { %v2968_v4 = vld [vmem:[%s3927_s3 + $0x24] sm:$0xf0]  ;;  %v2967_v5 = vor.u32 %v3510_v2, %v2966_v1  ;;  %v2954_v7 = vld [vmem:[%s3927_s3] sm:$0xf]  ;;  %v3507_v8 = vld [vmem:[%s3927_s3 + $0x8] sm:$0xf0] }
  0xde   : > { %v2971_v6 = vor.u32 %v3509_v3, %v2968_v4  ;;  %v3506_v9 = vld [vmem:[%s3927_s3 + $0x4] sm:$0xf]  ;;  %v2956_v10 = vld [vmem:[%s3927_s3 + $0xc] sm:$0xf0]  ;;  %v2955_v11 = vor.u32 %v3507_v8, %v2954_v7  ;;  %v3529_v16 = vld [vmem:[%s3927_s3 + $0xb8] sm:$0xf0] }
  0xdf   : > { %1080 = vmatpush.bf16.msra.mxu0 %v3015_v45  ;;  %v4024_v12 = vld [vmem:[#allocation2] sm:$0xff]  ;;  %v2959_v13 = vor.u32 %v3506_v9, %v2956_v10  ;;  %v3046_v15 = vld [vmem:[%s3927_s3 + $0xb0] sm:$0xf]  ;;  %v3034_v17 = vld [vmem:[%s3927_s3 + $0x98] sm:$0xf]  ;;  %s3768_s18 = smov 64  }
  0xe0   : > { %1093 = vmatpush.bf16.msra.mxu1 %v3019_v46  ;;  %v909_v14 = vpack.c.bf16 %v4024_v12, %v4024_v12  ;;  %v3047_v18 = vor.u32 %v3529_v16, %v3046_v15  ;;  %v3526_v19 = vld [vmem:[%s3927_s3 + $0xa0] sm:$0xf0]  ;;  %v4033_v21 = vld [vmem:[%s3937_s5] sm:$0x7]  ;;  %v3523_v31 = vld [vmem:[%s3927_s3 + $0x88] sm:$0xf0] }
  0xe1   : > { %v3035_v20 = vor.u32 %v3526_v19, %v3034_v17  ;;  %v945_v22 = vperm.slane %v4033_v21, 1  ;;  %v944_v26 = vperm.slane %v4033_v21, 0  ;;  %v3022_v30 = vld [vmem:[%s3927_s3 + $0x80] sm:$0xf]  ;;  %v3010_v33 = vld [vmem:[%s3927_s3 + $0x68] sm:$0xf] }
  0xe2   : > { %1104 = vmatpush.bf16.msra.mxu2 %v3047_v18  ;;  %v3023_v32 = vor.u32 %v3523_v31, %v3022_v30  ;;  %v3520_v34 = vld [vmem:[%s3927_s3 + $0x70] sm:$0xf0]  ;;  %v2998_v36 = vld [vmem:[%s3927_s3 + $0x50] sm:$0xf]  ;;  %v3517_v37 = vld [vmem:[%s3927_s3 + $0x58] sm:$0xf0] }
  0xe3   : > { %1081 = vmatpush.bf16.msra.mxu0 %v3003_v52  ;;  %v3011_v35 = vor.u32 %v3520_v34, %v3010_v33  ;;  %v2999_v38 = vor.u32 %v3517_v37, %v2998_v36  ;;  %v2986_v39 = vld [vmem:[%s3927_s3 + $0x38] sm:$0xf]  ;;  %v3514_v40 = vld [vmem:[%s3927_s3 + $0x40] sm:$0xf0]  ;;  %v2974_v42 = vld [vmem:[%s3927_s3 + $0x20] sm:$0xf] }
  0xe4   : > { %1094 = vmatpush.bf16.msra.mxu1 %v3007_v54  ;;  %v2987_v41 = vor.u32 %v3514_v40, %v2986_v39  ;;  %v3511_v43 = vld [vmem:[%s3927_s3 + $0x28] sm:$0xf0]  ;;  %v3769_v45 = vmov 1983009808   ;;  %v2962_v47 = vld [vmem:[%s3927_s3 + $0x8] sm:$0xf] }
  0xe5   : > { %v2975_v44 = vor.u32 %v3511_v43, %v2974_v42  ;;  %v1125_v46 = vunpack.c.l.s4 %v3769_v45  ;;  %v3508_v48 = vld [vmem:[%s3927_s3 + $0x10] sm:$0xf0]  ;;  %vm1122_vm4 = vcmask 1047556   ;;  %v3770_v52 = vmov 1934713408   ;;  %s4627_s24 = sld [smem:[#allocation15_spill]] }
  0xe6   : > { %1105 = vmatpush.bf16.msra.mxu2 %v3035_v20  ;;  %v2963_v49 = vor.u32 %v3508_v48, %v2962_v47  ;;  %v1147_v53 = vunpack.c.l.s4 %v3770_v52  ;;  %vm1404_vm5 = vcmask 523264   ;;  %vm1443_vm6 = vcmask 64512   ;;  %s4630_s4 = sld [smem:[#allocation3_spill]] }
  0xe7   : > { %1082 = vmatpush.bf16.msra.mxu0 %v2991_v57  ;;  %v4051_v50 = vunpack.c.0.s8 %v1125_v46  ;;  %vm1473_vm7 = vcmask 1043456  }
  0xe8   : > { %1095 = vmatpush.bf16.msra.mxu1 %v2995_v58  ;;  %v4056_v58 = vunpack.c.0.s8 %v1147_v53 }
  0xea   : > { %1106 = vmatpush.bf16.msra.mxu2 %v3023_v32 }
  0xeb   : > { %1083 = vmatpush.bf16.msra.mxu0 %v2979_v63  ;;  %s4628_s16 = scalar_lea.vmem %s4627_s24, %s3916_s0 }
  0xec   : > { %1096 = vmatpush.bf16.msra.mxu1 %v2983_v0  ;;  %p3340_p8 = scmp.ne.s32.totalorder %s4630_s4, 1 }
  0xed   : > { %s4631_s1 = sld [smem:[#allocation19_spill]] (!%p3340_p8) }
  0xee   : > { %1107 = vmatpush.bf16.msra.mxu2 %v3011_v35  ;;  %s4632_s0 = sld [smem:[#allocation21_spill]] (!%p3340_p8) }
  0xef   : > { %1084 = vmatpush.bf16.msra.mxu0 %v2967_v5  ;;  %s4633_s24 = sld [smem:[#allocation23_spill]] (!%p3340_p8) }
  0xf0   : > { %1097 = vmatpush.bf16.msra.mxu1 %v2971_v6  ;;  %s4634_s26 = sld [smem:[#allocation20_spill]] (!%p3340_p8) }
  0xf1   : > { %s4635_s3 = sld [smem:[#allocation22_spill]] (!%p3340_p8) }
  0xf2   : > { %1108 = vmatpush.bf16.msra.mxu2 %v2999_v38 }
  0xf3   : > { %1085 = vmatpush.bf16.msra.mxu0 %v2955_v11 }
  0xf4   : > { %1098 = vmatpush.bf16.msra.mxu1 %v2959_v13 }
  0xf6   : > { %1086 = vmatmul.bf16.vlgmr.msra.gmra.mxu0 %v909_v14  ;;  %1109 = vmatpush.bf16.msra.mxu2 %v2987_v41 }
  0xf7   : > { %1099 = vmatmul.bf16.vlgmr.msra.gmra.mxu1 %v909_v14 }
  0xfa   : > { %1110 = vmatpush.bf16.msra.mxu2 %v2975_v44 }
  0xfe   : > { %1111 = vmatpush.bf16.msra.mxu2 %v2963_v49 }
 0x101   : > { %1112 = vmatmul.bf16.vlgmr.msra.gmra.mxu2 %v909_v14 }
 0x173   : > { %v1087_v23 = vpop.f32.mrf.mxu0 }
 0x174   : > { %v1100_v24 = vpop.f32.mrf.mxu1  ;;  %v1088_v27 = vadd.f32 %v1087_v23, %v944_v26 }
 0x175   : > { %v1101_v25 = vadd.f32 %v1100_v24, %v945_v22 }
 0x176   : > { %v1121_v56 = vrot.slane %v1088_v27, 4  ;;  %v1127_v3 = vperm.slane %v1088_v27, %v4051_v50 }
 0x177   : > { %1213 = vrot.lane.b32.xlu0 %v1101_v25, %s3768_s18  ;;  %v1216_v51 = vrot.slane %v1101_v25, 4  ;;  %v1221_v55 = vperm.slane %v1101_v25, %v4051_v50 }
 0x178   : > { %v1123_v63 = vsel %vm1122_vm4, 0.0, %v1121_v56  ;;  %v1144_v15 = vrot.slane %v1127_v3, 4 }
 0x179   : > { %v1217_v54 = vsel %vm1122_vm4, 0.0, %v1216_v51  ;;  %v1238_v60 = vrot.slane %v1221_v55, 4  ;;  %v1131_v7 = vperm.slane %v1123_v63, %v4051_v50 }
 0x17a   : > { %v1225_v57 = vperm.slane %v1217_v54, %v4051_v50 }
 0x17b   : > { %v1089_v28 = vpop.f32.mrf.mxu0  ;;  %v1156_v25 = vrot.slane %v1131_v7, 4 }
 0x17c   : > { %v1102_v29 = vpop.f32.mrf.mxu1  ;;  %v1250_v4 = vrot.slane %v1225_v57, 4 }
 0x17f   : > { %1118 = vrot.lane.b32.xlu0 %v1088_v27, %s3768_s18 }
 0x1e9   : > { %v1214_v59 = vpop.permute.xlu0 %1213 }
 0x1ea   : > { %v1226_v61 = vrot.slane %v1214_v59, 4  ;;  %v1231_v62 = vperm.slane %v1214_v59, %v4051_v50 }
 0x1ec   : > { %v1227_v0 = vsel %vm1122_vm4, 0.0, %v1226_v61  ;;  %v1236_v1 = vrot.slane %v1231_v62, 4  ;;  %v1239_v2 = vsel %vm1122_vm4, %v1231_v62, %v1238_v60 }
 0x1ed   : > { %v1235_v5 = vperm.slane %v1227_v0, %v4051_v50  ;;  %v1247_v6 = vperm.slane %v1239_v2, %v4056_v58 }
 0x1ee   : > { %v1237_v8 = vsel %vm1122_vm4, %v1236_v1, %v1221_v55 }
 0x1ef   : > { %v1243_v9 = vperm.slane %v1237_v8, %v4056_v58  ;;  %v1248_v10 = vrot.slane %v1235_v5, 4  ;;  %v1251_v11 = vsel %vm1122_vm4, %v1235_v5, %v1250_v4  ;;  %v1262_v13 = vrot.slane %v1247_v6, 4 }
 0x1f0   : > { %v1259_v14 = vperm.slane %v1251_v11, %v4056_v58 }
 0x1f1   : > { %v1249_v16 = vsel %vm1122_vm4, %v1248_v10, %v1225_v57  ;;  %v1260_v17 = vrot.slane %v1243_v9, 4  ;;  %v1263_v18 = vsel %vm1122_vm4, 0.0, %v1262_v13  ;;  %v1119_v19 = vpop.permute.xlu0 %1118  ;;  %v1268_v27 = vsel %vm1122_vm4, %v1262_v13, %v1243_v9 }
 0x1f2   : > { %v1255_v20 = vperm.slane %v1249_v16, %v4056_v58  ;;  %v1266_v22 = vrot.slane %v1259_v14, 4  ;;  %v1273_v23 = vrot.slane %v1263_v18, 4  ;;  %v1132_v24 = vrot.slane %v1119_v19, 4 }
 0x1f3   : > { %v1261_v26 = vsel %vm1122_vm4, 0.0, %v1260_v17  ;;  %v1137_v28 = vperm.slane %v1119_v19, %v4051_v50  ;;  %v1272_v43 = vperm.slane %v1268_v27, %v4051_v50 }
 0x1f4   : > { %v1264_v29 = vrot.slane %v1255_v20, 4  ;;  %v1267_v30 = vsel %vm1122_vm4, 0.0, %v1266_v22  ;;  %v1133_v31 = vsel %vm1122_vm4, 0.0, %v1132_v24  ;;  %v1274_v32 = vsel %vm1122_vm4, %v1273_v23, %v1261_v26 }
 0x1f5   : > { %v1284_v33 = vrot.slane %v1267_v30, 4  ;;  %v1141_v34 = vperm.slane %v1133_v31, %v4051_v50  ;;  %v1142_v35 = vrot.slane %v1137_v28, 4  ;;  %v1145_v36 = vsel %vm1122_vm4, %v1137_v28, %v1144_v15 }
 0x1f6   : > { %v1265_v37 = vsel %vm1122_vm4, 0.0, %v1264_v29  ;;  %v1153_v38 = vperm.slane %v1145_v36, %v4056_v58  ;;  %v1278_v39 = vperm.slane %v1274_v32, %v4051_v50  ;;  %v1279_v49 = vsel %vm1122_vm4, %v1266_v22, %v1255_v20 }
 0x1f7   : > { %v1143_v40 = vsel %vm1122_vm4, %v1142_v35, %v1127_v3  ;;  %v1154_v41 = vrot.slane %v1141_v34, 4  ;;  %v1157_v42 = vsel %vm1122_vm4, %v1141_v34, %v1156_v25  ;;  %v1285_v47 = vsel %vm1122_vm4, %v1284_v33, %v1265_v37  ;;  %v1113_v37 = vpop.f32.mrf.mxu2 }
 0x1f8   : > { %v1149_v44 = vperm.slane %v1143_v40, %v4056_v58  ;;  %v1165_v45 = vperm.slane %v1157_v42, %v4056_v58  ;;  %v1168_v46 = vrot.slane %v1153_v38, 4  ;;  %v1289_v51 = vperm.slane %v1285_v47, %v4051_v50 }
 0x1f9   : > { %v1155_v48 = vsel %vm1122_vm4, %v1154_v41, %v1131_v7  ;;  %v1290_v52 = vrot.slane %v1278_v39, 4  ;;  %v1283_v0 = vperm.slane %v1279_v49, %v4051_v50  ;;  %v946_v36 = vperm.slane %v4033_v21, 2 }
 0x1fa   : > { %v1161_v53 = vperm.slane %v1155_v48, %v4056_v58  ;;  %v1166_v54 = vrot.slane %v1149_v44, 4  ;;  %v1169_v55 = vsel %vm1122_vm4, 0.0, %v1168_v46  ;;  %v1172_v56 = vrot.slane %v1165_v45, 4 }
 0x1fb   : > { %v1179_v57 = vrot.slane %v1169_v55, 4  ;;  %v1291_v59 = vsel %vm1122_vm4, %v1290_v52, %v1272_v43  ;;  %v1296_v60 = vrot.slane %v1289_v51, 4  ;;  %v1174_v5 = vsel %vm1122_vm4, %v1168_v46, %v1149_v44 }
 0x1fc   : > { %v1167_v61 = vsel %vm1122_vm4, 0.0, %v1166_v54  ;;  %v1170_v62 = vrot.slane %v1161_v53, 4  ;;  %v1173_v63 = vsel %vm1122_vm4, 0.0, %v1172_v56  ;;  %v1295_v3 = vperm.slane %v1291_v59, %v4056_v58 }
 0x1fd   : > { %v1180_v1 = vsel %vm1122_vm4, %v1179_v57, %v1167_v61  ;;  %v1190_v2 = vrot.slane %v1173_v63, 4  ;;  %v1297_v6 = vsel %vm1122_vm4, %v1296_v60, %v1283_v0  ;;  %v1185_v8 = vsel %vm1122_vm4, %v1172_v56, %v1161_v53 }
 0x1fe   : > { %v1171_v4 = vsel %vm1122_vm4, 0.0, %v1170_v62  ;;  %v1184_v7 = vperm.slane %v1180_v1, %v4051_v50  ;;  %v1301_v10 = vperm.slane %v1297_v6, %v4056_v58  ;;  %v1304_v11 = vrot.slane %v1295_v3, 4 }
 0x1ff   : > { %v1191_v9 = vsel %vm1122_vm4, %v1190_v2, %v1171_v4  ;;  %v1178_v17 = vperm.slane %v1174_v5, %v4051_v50  ;;  %v1189_v18 = vperm.slane %v1185_v8, %v4051_v50  ;;  %v1114_v38 = vadd.f32 %v1113_v37, %v946_v36  ;;  %v1115_v39 = vpop.f32.mrf.mxu2 }
 0x200   : > { %v1195_v13 = vperm.slane %v1191_v9, %v4051_v50  ;;  %v1196_v14 = vrot.slane %v1184_v7, 4  ;;  %v1302_v15 = vrot.slane %v1301_v10, 4  ;;  %v1305_v16 = vsel %vm1122_vm4, %v1301_v10, %v1304_v11 }
 0x201   : > { %v1403_v22 = vpack.c.bf16 %v1305_v16, %v1305_v16  ;;  %1307 = vrot.lane.b32.xlu2 %v1114_v38, %s3768_s18  ;;  %v1310_v45 = vrot.slane %v1114_v38, 4  ;;  %v1315_v47 = vperm.slane %v1114_v38, %v4051_v50 }
 0x202   : > { %v1202_v19 = vrot.slane %v1195_v13, 4  ;;  %v1303_v20 = vsel %vm1122_vm4, %v1302_v15, %v1295_v3  ;;  %v1197_v24 = vsel %vm1122_vm4, %v1196_v14, %v1178_v17 }
 0x203   : > { %v1402_v23 = vpack.c.bf16 %v1303_v20, %v1303_v20  ;;  %v1428_v28 = vsel %vm1404_vm5, %v1403_v22, 0  ;;  %v1201_v29 = vperm.slane %v1197_v24, %v4056_v58  ;;  %v1311_v46 = vsel %vm1122_vm4, 0.0, %v1310_v45 }
 0x204   : > { %v1203_v25 = vsel %vm1122_vm4, %v1202_v19, %v1189_v18  ;;  %v1319_v48 = vperm.slane %v1311_v46, %v4051_v50  ;;  %v1332_v49 = vrot.slane %v1315_v47, 4 }
 0x205   : > { %v1207_v26 = vperm.slane %v1203_v25, %v4056_v58  ;;  %v1409_v27 = vsel %vm1404_vm5, %v1402_v23, 0  ;;  %v1210_v33 = vrot.slane %v1201_v29, 4 }
 0x206   : > { %1418 = vmatpush.bf16.xpose.msra.mxu3 %v1409_v27  ;;  %v1344_v54 = vrot.slane %v1319_v48, 4 }
 0x207   : > { %v1208_v30 = vrot.slane %v1207_v26, 4  ;;  %v1211_v34 = vsel %vm1122_vm4, %v1207_v26, %v1210_v33 }
 0x208   : > { %v1401_v35 = vpack.c.bf16 %v1211_v34, %v1211_v34 }
 0x209   : > { %v1209_v31 = vsel %vm1122_vm4, %v1208_v30, %v1201_v29 }
 0x20a   : > { %v1400_v32 = vpack.c.bf16 %v1209_v31, %v1209_v31 }
 0x20d   : > { %3048 = vmatmul.msk.bf16.vlgmr.msra.gmra.mxu3 %vm1404_vm5, %v1400_v32 }
 0x20e   : > { %1437 = vmatpush.bf16.xpose.msrb.mxu3 %v1428_v28 }
 0x21d   : > { %3049 = vmatmul.msk.bf16.vlgmr.msrb.gmra.mxu3 %vm1404_vm5, %v1401_v35 }
 0x25b   : > { %v1308_v51 = vpop.permute.xlu2 %1307 }
 0x25c   : > { %v1320_v52 = vrot.slane %v1308_v51, 4  ;;  %v1325_v53 = vperm.slane %v1308_v51, %v4051_v50 }
 0x25e   : > { %v1321_v55 = vsel %vm1122_vm4, 0.0, %v1320_v52  ;;  %v1330_v56 = vrot.slane %v1325_v53, 4  ;;  %v1333_v57 = vsel %vm1122_vm4, %v1325_v53, %v1332_v49 }
 0x25f   : > { %v1329_v59 = vperm.slane %v1321_v55, %v4051_v50  ;;  %v1341_v60 = vperm.slane %v1333_v57, %v4056_v58  ;;  %v3537_v57 = vld [vmem:[%s3932_s19 + $0x38] sm:$0xff] }
 0x260   : > { %v1331_v61 = vsel %vm1122_vm4, %v1330_v56, %v1315_v47  ;;  %1673 = vmatpush.bf16.msrb.mxu1 %v3537_v57 }
 0x261   : > { %v1337_v62 = vperm.slane %v1331_v61, %v4056_v58  ;;  %v1342_v63 = vrot.slane %v1329_v59, 4  ;;  %v1345_v0 = vsel %vm1122_vm4, %v1329_v59, %v1344_v54  ;;  %v1356_v1 = vrot.slane %v1341_v60, 4  ;;  %v3536_v60 = vld [vmem:[%s3932_s19 + $0x30] sm:$0xff] }
 0x262   : > { %v1353_v2 = vperm.slane %v1345_v0, %v4056_v58 }
 0x263   : > { %v1343_v3 = vsel %vm1122_vm4, %v1342_v63, %v1319_v48  ;;  %v1354_v4 = vrot.slane %v1337_v62, 4  ;;  %v1357_v5 = vsel %vm1122_vm4, 0.0, %v1356_v1  ;;  %v1362_v8 = vsel %vm1122_vm4, %v1356_v1, %v1337_v62  ;;  %v3535_v63 = vld [vmem:[%s3932_s19 + $0x28] sm:$0xff] }
 0x264   : > { %v1349_v6 = vperm.slane %v1343_v3, %v4056_v58  ;;  %v1360_v7 = vrot.slane %v1353_v2, 4  ;;  %v1367_v9 = vrot.slane %v1357_v5, 4  ;;  %v1366_v15 = vperm.slane %v1362_v8, %v4051_v50  ;;  %1674 = vmatpush.bf16.msrb.mxu1 %v3536_v60 }
 0x265   : > { %v1355_v10 = vsel %vm1122_vm4, 0.0, %v1354_v4 }
 0x266   : > { %v1358_v11 = vrot.slane %v1349_v6, 4  ;;  %v1361_v13 = vsel %vm1122_vm4, 0.0, %v1360_v7  ;;  %v1368_v14 = vsel %vm1122_vm4, %v1367_v9, %v1355_v10  ;;  %v1373_v17 = vsel %vm1122_vm4, %v1360_v7, %v1349_v6  ;;  %v3534_v6 = vld [vmem:[%s3932_s19 + $0x20] sm:$0xff] }
 0x267   : > { %v1372_v16 = vperm.slane %v1368_v14, %v4051_v50  ;;  %v1378_v18 = vrot.slane %v1361_v13, 4  ;;  %v1377_v23 = vperm.slane %v1373_v17, %v4051_v50 }
 0x268   : > { %v1359_v19 = vsel %vm1122_vm4, 0.0, %v1358_v11  ;;  %1675 = vmatpush.bf16.msrb.mxu1 %v3535_v63  ;;  %v3198_v63 = vld [vmem:[%s3956_s17 + $0xe0] sm:$0xf] }
 0x269   : > { %v1379_v20 = vsel %vm1122_vm4, %v1378_v18, %v1359_v19  ;;  %v1384_v22 = vrot.slane %v1372_v16, 4 }
 0x26a   : > { %v1383_v24 = vperm.slane %v1379_v20, %v4051_v50 }
 0x26b   : > { %v1385_v25 = vsel %vm1122_vm4, %v1384_v22, %v1366_v15  ;;  %v3533_v15 = vld [vmem:[%s3932_s19 + $0x18] sm:$0xff] }
 0x26c   : > { %v1389_v26 = vperm.slane %v1385_v25, %v4056_v58  ;;  %v1390_v27 = vrot.slane %v1383_v24, 4  ;;  %1676 = vmatpush.bf16.msrb.mxu1 %v3534_v6 }
 0x26e   : > { %v1391_v28 = vsel %vm1122_vm4, %v1390_v27, %v1377_v23  ;;  %v1398_v29 = vrot.slane %v1389_v26, 4 }
 0x26f   : > { %v1395_v30 = vperm.slane %v1391_v28, %v4056_v58 }
 0x270   : > { %1677 = vmatpush.bf16.msrb.mxu1 %v3533_v15 }
 0x271   : > { %v1396_v31 = vrot.slane %v1395_v30, 4  ;;  %v1399_v32 = vsel %vm1122_vm4, %v1395_v30, %v1398_v29  ;;  %v3532_v29 = vld [vmem:[%s3932_s19 + $0x10] sm:$0xff] }
 0x272   : > { %v1469_v33 = vpack.c.bf16 %v1399_v32, %v1399_v32 }
 0x273   : > { %v1397_v34 = vsel %vm1122_vm4, %v1396_v31, %v1389_v26 }
 0x274   : > { %v1468_v35 = vpack.c.bf16 %v1397_v34, %v1397_v34  ;;  %v1494_v36 = vsel %vm1473_vm7, %v1469_v33, 0  ;;  %1678 = vmatpush.bf16.msrb.mxu1 %v3532_v29 }
 0x275   : > { %1503 = vmatpush.bf16.msrb.mxu0 %v1494_v36 }
 0x276   : > { %v1475_v37 = vsel %vm1473_vm7, %v1468_v35, 0 }
 0x277   : > { %1484 = vmatpush.bf16.msra.mxu3 %v1475_v37 }
 0x290   : > { %v4125_v40 = vpop.f32.mrf.mxu3 }
 0x291   : > { %v1444_v41 = vsel %vm1443_vm6, %v4125_v40, -inf }
 0x292   : > { %1445 = vmax.xlane.f32.xlu1 %v1444_v41 }
 0x298   : > { %v1422_v42 = vpop.f32.mrf.mxu3 }
 0x2a0   : > { %v4129_v43 = vpop.f32.mrf.mxu3 }
 0x2a1   : > { %v1447_v44 = vsel %vm1443_vm6, %v4129_v43, -inf }
 0x2a2   : > { %1448 = vmax.xlane.f32.xlu1 %v1447_v44 }
 0x2a8   : > { %v1441_v21 = vpop.f32.mrf.mxu3 }
 0x305   : > { %v1446_v38 = vpop.xlane.xlu1 %1445 }
 0x306   : > { %v1450_v39 = vsub.f32 %v4125_v40, %v1446_v38  ;;  %v3531_v38 = vld [vmem:[%s3932_s19 + $0x8] sm:$0xff] }
 0x307   : > { %1679 = vmatpush.bf16.msrb.mxu1 %v3531_v38 }
 0x308   : > { %v1452_v41 = vmul.f32 1.442695, %v1450_v39 }
 0x30a   : > { %3701 = vpow2.f32 %v1452_v41 }
 0x310   : > { %v3702_v42 = vpop.eup %3701 }
 0x311   : > { %v1456_v44 = vsel %vm1443_vm6, %v3702_v42, 0.0 }
 0x312   : > { %1457 = vadd.xlane.f32.xlu2 %v1456_v44 }
 0x315   : > { %v1449_v21 = vpop.xlane.xlu1 %1448 }
 0x316   : > { %v1451_v45 = vsub.f32 %v4129_v43, %v1449_v21 }
 0x318   : > { %v1454_v46 = vmul.f32 1.442695, %v1451_v45 }
 0x31a   : > { %3703 = vpow2.f32 %v1454_v46 }
 0x320   : > { %v3704_v47 = vpop.eup %3703 }
 0x321   : > { %v1459_v48 = vsel %vm1443_vm6, %v3704_v47, 0.0 }
 0x322   : > { %1460 = vadd.xlane.f32.xlu0 %v1459_v48 }
 0x385   : > { %v1458_v49 = vpop.xlane.xlu2 %1457 }
 0x386   : > { %3705 = vrcp.f32 %v1458_v49 }
 0x38c   : > { %v3706_v40 = vpop.eup %3705 }
 0x38d   : > { %v1464_v51 = vmul.f32 %v3706_v40, %v3702_v42 }
 0x38f   : > { %v1466_v52 = vpack.c.bf16 %v1464_v51, %v1464_v51 }
 0x391   : > { %3050 = vmatmul.msk.bf16.vlgmr.msra.gmra.mxu3 %vm1443_vm6, %v1466_v52 }
 0x395   : > { %v1461_v53 = vpop.xlane.xlu0 %1460 }
 0x396   : > { %3707 = vrcp.f32 %v1461_v53 }
 0x39c   : > { %v3708_v54 = vpop.eup %3707 }
 0x39d   : > { %v1465_v43 = vmul.f32 %v3708_v54, %v3704_v47 }
 0x39f   : > { %v1467_v55 = vpack.c.bf16 %v1465_v43, %v1465_v43 }
 0x3a1   : > { %3051 = vmatmul.msk.bf16.vlgmr.msrb.gmra.mxu0 %vm1443_vm6, %v1467_v55 }
 0x414   : > { %v1486_v56 = vpop.f32.mrf.mxu3 }
 0x415   : > { %v1509_v59 = vrot.slane %v1486_v56, 4  ;;  %v1514_v62 = vperm.slane %v1486_v56, %v4051_v50 }
 0x417   : > { %v1510_v61 = vsel %vm1122_vm4, 0.0, %v1509_v59  ;;  %v1531_v3 = vrot.slane %v1514_v62, 4 }
 0x418   : > { %v1518_v1 = vperm.slane %v1510_v61, %v4051_v50 }
 0x41a   : > { %v1543_v10 = vrot.slane %v1518_v1, 4 }
 0x41c   : > { %v1488_v0 = vpop.f32.mrf.mxu3 }
 0x41d   : > { %v3568_v0 = vld [vmem:[%s3956_s17 + $0xec] sm:$0xf0] }
 0x41e   : > { %v1505_v2 = vpop.f32.mrf.mxu0 }
 0x41f   : > { %v1519_v4 = vrot.slane %v1505_v2, 4  ;;  %v1524_v5 = vperm.slane %v1505_v2, %v4051_v50  ;;  %v3199_v2 = vor.u32 %v3568_v0, %v3198_v63 }
 0x421   : > { %v1520_v7 = vsel %vm1122_vm4, 0.0, %v1519_v4  ;;  %v1529_v8 = vrot.slane %v1524_v5, 4  ;;  %v1532_v9 = vsel %vm1122_vm4, %v1524_v5, %v1531_v3  ;;  %v3200_v3 = vld [vmem:[%s3956_s17 + $0xf0] sm:$0xf0]  ;;  %v3206_v4 = vld [vmem:[%s3956_s17 + $0xe8] sm:$0xf]  ;;  %1929 = vmatpush.bf16.msrb.mxu2 %v3199_v2 }
 0x422   : > { %v1528_v11 = vperm.slane %v1520_v7, %v4051_v50  ;;  %v1540_v13 = vperm.slane %v1532_v9, %v4056_v58  ;;  %v3771_v5 = vmov 128.0   ;;  %v3208_v9 = vld [vmem:[%s3956_s17 + $0xf8] sm:$0xf0]  ;;  %v3548_v2 = vld [vmem:[%s3956_s17 + $0x4c] sm:$0xf0] }
 0x423   : > { %v1530_v14 = vsel %vm1122_vm4, %v1529_v8, %v1514_v62  ;;  %3709 = vrcp.f32 %v3771_v5  ;;  %v3567_v8 = vld [vmem:[%s3956_s17 + $0xec] sm:$0xf]  ;;  %v3126_v5 = vld [vmem:[%s3956_s17 + $0x48] sm:$0xf] }
 0x424   : > { %v1536_v16 = vperm.slane %v1530_v14, %v4056_v58  ;;  %v1541_v17 = vrot.slane %v1528_v11, 4  ;;  %v1544_v18 = vsel %vm1122_vm4, %v1528_v11, %v1543_v10  ;;  %v1555_v19 = vrot.slane %v1540_v13, 4  ;;  %v3182_v11 = vld [vmem:[%s3956_s17 + $0xc0] sm:$0xf]  ;;  %v3564_v13 = vld [vmem:[%s3956_s17 + $0xcc] sm:$0xf0] }
 0x425   : > { %v1552_v20 = vperm.slane %v1544_v18, %v4056_v58  ;;  %v3211_v10 = vor.u32 %v3567_v8, %v3208_v9  ;;  %v3562_v14 = vld [vmem:[%s3956_s17 + $0xc4] sm:$0xf]  ;;  %v3183_v15 = vor.u32 %v3564_v13, %v3182_v11  ;;  %v3565_v18 = vld [vmem:[%s3956_s17 + $0xd4] sm:$0xf0]  ;;  %v3547_v9 = vld [vmem:[%s3956_s17 + $0x4c] sm:$0xf] }
 0x426   : > { %v1542_v22 = vsel %vm1122_vm4, %v1541_v17, %v1518_v1  ;;  %v1553_v23 = vrot.slane %v1536_v16, 4  ;;  %v1556_v24 = vsel %vm1122_vm4, 0.0, %v1555_v19  ;;  %v1507_v25 = vpop.f32.mrf.mxu0  ;;  %v1561_v33 = vsel %vm1122_vm4, %v1555_v19, %v1536_v16  ;;  %v3566_v1 = vld [vmem:[%s3956_s17 + $0xe4] sm:$0xf]  ;;  %v3184_v16 = vld [vmem:[%s3956_s17 + $0xd0] sm:$0xf0] }
 0x427   : > { %v1548_v26 = vperm.slane %v1542_v22, %v4056_v58  ;;  %v1559_v27 = vrot.slane %v1552_v20, 4  ;;  %v1566_v28 = vrot.slane %v1556_v24, 4  ;;  %v1565_v39 = vperm.slane %v1561_v33, %v4051_v50  ;;  %v3190_v17 = vld [vmem:[%s3956_s17 + $0xc8] sm:$0xf]  ;;  %v3563_v22 = vld [vmem:[%s3956_s17 + $0xcc] sm:$0xf]  ;;  %1930 = vmatpush.bf16.msrb.mxu2 %v3183_v15 }
 0x428   : > { %v1554_v30 = vsel %vm1122_vm4, 0.0, %v1553_v23  ;;  %v3203_v6 = vor.u32 %v3566_v1, %v3200_v3  ;;  %v3187_v19 = vor.u32 %v3562_v14, %v3184_v16  ;;  %v3191_v20 = vor.u32 %v3565_v18, %v3190_v17  ;;  %v3192_v23 = vld [vmem:[%s3956_s17 + $0xd8] sm:$0xf0]  ;;  %v3118_v1 = vld [vmem:[%s3956_s17 + $0x40] sm:$0xf] }
 0x429   : > { %v1557_v31 = vrot.slane %v1548_v26, 4  ;;  %v1560_v32 = vsel %vm1122_vm4, 0.0, %v1559_v27  ;;  %v1567_v34 = vsel %vm1122_vm4, %v1566_v28, %v1554_v30  ;;  %v1572_v41 = vsel %vm1122_vm4, %v1559_v27, %v1548_v26  ;;  %v4240_v25 = vpop.eup %3709  ;;  %v3166_v26 = vld [vmem:[%s3956_s17 + $0xa0] sm:$0xf]  ;;  %v3560_v27 = vld [vmem:[%s3956_s17 + $0xac] sm:$0xf0] }
 0x42a   : > { %v1577_v35 = vrot.slane %v1560_v32, 4  ;;  %v1571_v36 = vperm.slane %v1567_v34, %v4051_v50  ;;  %v1576_v46 = vperm.slane %v1572_v41, %v4051_v50  ;;  %1942 = vmatpush.bf16.msrb.mxu3 %v3203_v6  ;;  %v3195_v24 = vor.u32 %v3563_v22, %v3192_v23  ;;  %v3558_v28 = vld [vmem:[%s3956_s17 + $0xa4] sm:$0xf]  ;;  %v3168_v30 = vld [vmem:[%s3956_s17 + $0xb0] sm:$0xf0] }
 0x42b   : > { %v1558_v37 = vsel %vm1122_vm4, 0.0, %v1557_v31  ;;  %v3167_v29 = vor.u32 %v3560_v27, %v3166_v26  ;;  %v3174_v31 = vld [vmem:[%s3956_s17 + $0xa8] sm:$0xf]  ;;  %v3561_v32 = vld [vmem:[%s3956_s17 + $0xb4] sm:$0xf0]  ;;  %v3171_v33 = vor.u32 %v3558_v28, %v3168_v30  ;;  %vm1696_vm8 = vweird.f32 %v4240_v25 }
 0x42c   : > { %v1578_v42 = vsel %vm1122_vm4, %v1577_v35, %v1558_v37  ;;  %v1583_v44 = vrot.slane %v1571_v36, 4  ;;  %v3175_v34 = vor.u32 %v3561_v32, %v3174_v31  ;;  %v3559_v35 = vld [vmem:[%s3956_s17 + $0xac] sm:$0xf]  ;;  %v3176_v36 = vld [vmem:[%s3956_s17 + $0xb8] sm:$0xf0]  ;;  %v1692_v37 = vmul.f32 128.0, %v4240_v25 }
 0x42d   : > { %v1582_v21 = vperm.slane %v1578_v42, %v4051_v50  ;;  %v3530_v50 = vld [vmem:[%s3932_s19] sm:$0xff]  ;;  %1931 = vmatpush.bf16.msrb.mxu2 %v3167_v29  ;;  %v3179_v38 = vor.u32 %v3559_v35, %v3176_v36  ;;  %v3556_v41 = vld [vmem:[%s3956_s17 + $0x8c] sm:$0xf0]  ;;  %v3549_v6 = vld [vmem:[%s3956_s17 + $0x54] sm:$0xf0] }
 0x42e   : > { %v1584_v45 = vsel %vm1122_vm4, %v1583_v44, %v1565_v39  ;;  %1680 = vmatpush.bf16.msrb.mxu1 %v3530_v50  ;;  %1943 = vmatpush.bf16.msrb.mxu3 %v3187_v19  ;;  %v3150_v39 = vld [vmem:[%s3956_s17 + $0x80] sm:$0xf]  ;;  %v3554_v42 = vld [vmem:[%s3956_s17 + $0x84] sm:$0xf]  ;;  %v3127_v8 = vor.u32 %v3549_v6, %v3126_v5  ;;  %v3544_v15 = vld [vmem:[%s3956_s17 + $0x2c] sm:$0xf0] }
 0x42f   : > { %v1588_v47 = vperm.slane %v1584_v45, %v4056_v58  ;;  %v1589_v48 = vrot.slane %v1582_v21, 4  ;;  %v3151_v44 = vor.u32 %v3556_v41, %v3150_v39  ;;  %v3152_v21 = vld [vmem:[%s3956_s17 + $0x90] sm:$0xf0]  ;;  %v3158_v45 = vld [vmem:[%s3956_s17 + $0x88] sm:$0xf]  ;;  %v3590_v5 = vld [vmem:[%s3966_s14 + $0xa0] sm:$0xff] }
 0x430   : > { %v3550_v50 = vld [vmem:[%s3956_s17 + $0x64] sm:$0xf]  ;;  %v3102_v14 = vld [vmem:[%s3956_s17 + $0x20] sm:$0xf]  ;;  %v3104_v18 = vld [vmem:[%s3956_s17 + $0x30] sm:$0xf0] }
 0x431   : > { %v1590_v49 = vsel %vm1122_vm4, %v1589_v48, %v1576_v46  ;;  %v1597_v40 = vrot.slane %v1588_v47, 4  ;;  %v3557_v46 = vld [vmem:[%s3956_s17 + $0x94] sm:$0xf0]  ;;  %1932 = vmatpush.bf16.msrb.mxu2 %v3151_v44  ;;  %v3546_v3 = vld [vmem:[%s3956_s17 + $0x44] sm:$0xf]  ;;  %v3103_v17 = vor.u32 %v3544_v15, %v3102_v14  ;;  %v3588_v14 = vld [vmem:[%s3966_s14 + $0x90] sm:$0xff] }
 0x432   : > { %v1594_v51 = vperm.slane %v1590_v49, %v4056_v58  ;;  %v3695_v58 = vld [vmem:[%s4625_s22] ss:$0 sm:$0xff]  ;;  %1968 = vmatpush.bf16.msra.mxu1 %v3211_v10  ;;  %1944 = vmatpush.bf16.msrb.mxu3 %v3171_v33  ;;  %v3159_v48 = vor.u32 %v3557_v46, %v3158_v45  ;;  %v3555_v49 = vld [vmem:[%s3956_s17 + $0x8c] sm:$0xf]  ;;  %v3128_v10 = vld [vmem:[%s3956_s17 + $0x58] sm:$0xf0] }
 0x433   : > { %v3131_v11 = vor.u32 %v3547_v9, %v3128_v10  ;;  %v3542_v16 = vld [vmem:[%s3956_s17 + $0x24] sm:$0xf]  ;;  %v3110_v19 = vld [vmem:[%s3956_s17 + $0x28] sm:$0xf]  ;;  %v3112_v26 = vld [vmem:[%s3956_s17 + $0x38] sm:$0xf0] }
 0x434   : > { %v1598_v52 = vsel %vm1122_vm4, %v1594_v51, %v1597_v40  ;;  %v1595_v53 = vrot.slane %v1594_v51, 4  ;;  %v3160_v40 = vld [vmem:[%s3956_s17 + $0x98] sm:$0xf0]  ;;  %v1693_v51 = vsub.f32 1.0, %v1692_v37  ;;  %v3107_v22 = vor.u32 %v3542_v16, %v3104_v18  ;;  %v3086_v27 = vld [vmem:[%s3956_s17] sm:$0xf] }
 0x435   : > { %1600 = vrot.lane.b32.xlu1 %v1598_v52, %s3768_s18  ;;  %v3163_v52 = vor.u32 %v3555_v49, %v3160_v40  ;;  %v3540_v29 = vld [vmem:[%s3956_s17 + $0xc] sm:$0xf0]  ;;  %v3538_v30 = vld [vmem:[%s3956_s17 + $0x4] sm:$0xf]  ;;  %v3088_v31 = vld [vmem:[%s3956_s17 + $0x10] sm:$0xf0] }
 0x436   : > { %v1596_v54 = vsel %vm1122_vm4, %v1595_v53, %v1588_v47  ;;  %1969 = vmatpush.bf16.msra.mxu1 %v3195_v24  ;;  %v3155_v47 = vor.u32 %v3554_v42, %v3152_v21  ;;  %v3134_v53 = vld [vmem:[%s3956_s17 + $0x60] sm:$0xf]  ;;  %v1694_v0 = vmul.f32 %v4240_v25, %v1693_v51  ;;  %v3543_v24 = vld [vmem:[%s3956_s17 + $0x2c] sm:$0xf]  ;;  %v3087_v33 = vor.u32 %v3540_v29, %v3086_v27  ;;  %v3094_v35 = vld [vmem:[%s3956_s17 + $0x8] sm:$0xf] }
 0x437   : > { %v3115_v28 = vor.u32 %v3543_v24, %v3112_v26  ;;  %v3541_v36 = vld [vmem:[%s3956_s17 + $0x14] sm:$0xf0]  ;;  %v3539_v37 = vld [vmem:[%s3956_s17 + $0xc] sm:$0xf]  ;;  %v3096_v39 = vld [vmem:[%s3956_s17 + $0x18] sm:$0xf0] }
 0x438   : > { %1945 = vmatpush.bf16.msrb.mxu3 %v3155_v47  ;;  %v1695_v13 = vadd.f32 %v4240_v25, %v1694_v0  ;;  %v3099_v42 = vor.u32 %v3539_v37, %v3096_v39  ;;  %v3593_v46 = vld [vmem:[%s3966_s14 + $0xb8] sm:$0xff]  ;;  %v3592_v49 = vld [vmem:[%s3966_s14 + $0xb0] sm:$0xff]  ;;  %v3598_v6 = vld [vmem:[%s3966_s14 + $0xe0] sm:$0xff]  ;;  %s4636_s22 = sld [smem:[#allocation24_spill]] (!%p3340_p8) }
 0x439   : > { %v3601_v47 = vld [vmem:[%s3966_s14 + $0xf8] sm:$0xff]  ;;  %v3600_v40 = vld [vmem:[%s3966_s14 + $0xf0] sm:$0xff]  ;;  %v3587_v18 = vld [vmem:[%s3966_s14 + $0x88] sm:$0xff] }
 0x43a   : > { %1970 = vmatpush.bf16.msra.mxu1 %v3179_v38  ;;  %v4293_v32 = vsel %vm1696_vm8, %v4240_v25, %v1695_v13  ;;  %v3095_v38 = vor.u32 %v3541_v36, %v3094_v35  ;;  %v3577_v0 = vld [vmem:[%s3966_s14 + $0x38] sm:$0xff]  ;;  %v3582_v13 = vld [vmem:[%s3966_s14 + $0x60] sm:$0xff]  ;;  %v3596_v15 = vld [vmem:[%s3966_s14 + $0xd0] sm:$0xff] }
 0x43b   : > { %v3589_v9 = vld [vmem:[%s3966_s14 + $0x98] sm:$0xff]  ;;  %v3594_v24 = vld [vmem:[%s3966_s14 + $0xc0] sm:$0xff]  ;;  %v3571_v26 = vld [vmem:[%s3966_s14 + $0x8] sm:$0xff] }
 0x43c   : > { %v3597_v10 = vld [vmem:[%s3966_s14 + $0xd8] sm:$0xff]  ;;  %v3579_v27 = vld [vmem:[%s3966_s14 + $0x48] sm:$0xff]  ;;  %v3570_v29 = vld [vmem:[%s3966_s14] sm:$0xff] }
 0x43d   : > { %v3573_v16 = vld [vmem:[%s3966_s14 + $0x18] sm:$0xff] }
 0x43e   : > { %1971 = vmatpush.bf16.msra.mxu1 %v3163_v52 }
 0x4a7   : > { %v1601_v43 = vpop.permute.xlu1 %1600 }
 0x4a8   : > { %v1603_v55 = vsel %vm1404_vm5, %v1596_v54, %v1601_v43  ;;  %v3552_v54 = vld [vmem:[%s3956_s17 + $0x6c] sm:$0xf0] }
 0x4a9   : > { %v1604_v56 = vpack.c.bf16 %v1603_v55, %v1603_v55  ;;  %v3135_v43 = vor.u32 %v3552_v54, %v3134_v53  ;;  %v3136_v55 = vld [vmem:[%s3956_s17 + $0x70] sm:$0xf0] }
 0x4ab   : > { %1681 = vmatmul.bf16.vlgmr.msrb.gmra.mxu1 %v1604_v56  ;;  %v3142_v56 = vld [vmem:[%s3956_s17 + $0x68] sm:$0xf]  ;;  %1933 = vmatpush.bf16.msrb.mxu2 %v3135_v43 }
 0x528   : > { %v1682_v57 = vpop.f32.mrf.mxu1 }
 0x529   : > { %v1683_v59 = vadd.f32 %v3695_v58, %v1682_v57  ;;  %v3553_v58 = vld [vmem:[%s3956_s17 + $0x74] sm:$0xf0]  ;;  %v3139_v57 = vor.u32 %v3550_v50, %v3136_v55 }
 0x52b   : > { %v4219_v60 = vadd.f32 %v1683_v59, %v4024_v12  ;;  %v3569_v12 = vld [vmem:[%s3956_s17 + $0xf4] sm:$0xf0]  ;;  %v3143_v59 = vor.u32 %v3553_v58, %v3142_v56  ;;  %1946 = vmatpush.bf16.msrb.mxu3 %v3139_v57  ;;  %v3696_v58 = vld [vmem:[%s4626_s21] ss:$0 sm:$0xff] }
 0x52c   : > { %v3207_v7 = vor.u32 %v3569_v12, %v3206_v4  ;;  %v3119_v4 = vor.u32 %v3548_v2, %v3118_v1  ;;  %v3120_v12 = vld [vmem:[%s3956_s17 + $0x50] sm:$0xf0]  ;;  %v3585_v1 = vld [vmem:[%s3966_s14 + $0x78] sm:$0xff]  ;;  %v3591_v2 = vld [vmem:[%s3966_s14 + $0xa8] sm:$0xff] }
 0x52d   : > { %1689 = vadd.xlane.f32.xlu1 %v4219_v60  ;;  %v1699_v61 = vmul.f32 %v4219_v60, %v4219_v60 }
 0x52e   : > { %1955 = vmatpush.bf16.msra.mxu0 %v3207_v7  ;;  %v3123_v7 = vor.u32 %v3546_v3, %v3120_v12  ;;  %1934 = vmatpush.bf16.msrb.mxu2 %v3119_v4  ;;  %v3599_v3 = vld [vmem:[%s3966_s14 + $0xe8] sm:$0xff]  ;;  %v3576_v4 = vld [vmem:[%s3966_s14 + $0x30] sm:$0xff] }
 0x52f   : > { %1700 = vadd.xlane.f32.xlu2 %v1699_v61  ;;  %v3551_v61 = vld [vmem:[%s3956_s17 + $0x6c] sm:$0xf]  ;;  %v3584_v12 = vld [vmem:[%s3966_s14 + $0x70] sm:$0xff] }
 0x530   : > { %v1684_v62 = vpop.f32.mrf.mxu1  ;;  %1947 = vmatpush.bf16.msrb.mxu3 %v3123_v7  ;;  %v3575_v7 = vld [vmem:[%s3966_s14 + $0x28] sm:$0xff] }
 0x531   : > { %v3144_v62 = vld [vmem:[%s3956_s17 + $0x78] sm:$0xf0] }
 0x532   : > { %1956 = vmatpush.bf16.msra.mxu0 %v3191_v20  ;;  %v3147_v63 = vor.u32 %v3551_v61, %v3144_v62  ;;  %v3545_v20 = vld [vmem:[%s3956_s17 + $0x34] sm:$0xf0]  ;;  %1935 = vmatpush.bf16.msrb.mxu2 %v3103_v17  ;;  %v3697_v61 = vld [vmem:[%s4628_s16] ss:$0 sm:$0xff] }
 0x533   : > { %v3111_v23 = vor.u32 %v3545_v20, %v3110_v19  ;;  %v3581_v17 = vld [vmem:[%s3966_s14 + $0x58] sm:$0xff]  ;;  %v3595_v19 = vld [vmem:[%s3966_s14 + $0xc8] sm:$0xff]  ;;  %v3572_v20 = vld [vmem:[%s3966_s14 + $0x10] sm:$0xff] }
 0x534   : > { %1972 = vmatpush.bf16.msra.mxu1 %v3147_v63  ;;  %1948 = vmatpush.bf16.msrb.mxu3 %v3107_v22  ;;  %v3580_v22 = vld [vmem:[%s3966_s14 + $0x50] sm:$0xff] }
 0x536   : > { %1957 = vmatpush.bf16.msra.mxu0 %v3175_v34  ;;  %v3091_v34 = vor.u32 %v3538_v30, %v3088_v31  ;;  %1936 = vmatpush.bf16.msrb.mxu2 %v3087_v33  ;;  %v3578_v30 = vld [vmem:[%s3966_s14 + $0x40] sm:$0xff] }
 0x538   : > { %1973 = vmatpush.bf16.msra.mxu1 %v3131_v11  ;;  %1949 = vmatpush.bf16.msrb.mxu3 %v3091_v34  ;;  %v3574_v11 = vld [vmem:[%s3966_s14 + $0x20] sm:$0xff] }
 0x53a   : > { %1958 = vmatpush.bf16.msra.mxu0 %v3159_v48  ;;  %2281 = vmatpush.bf16.msra.mxu2 %v3577_v0 }
 0x53c   : > { %1974 = vmatpush.bf16.msra.mxu1 %v3115_v28  ;;  %2294 = vmatpush.bf16.msra.mxu3 %v3585_v1  ;;  %v1759_v28 = vld [vmem:[%s3961_s15] sm:$0xf] }
 0x53d   : > { %v1763_v31 = vperm.slane %v1759_v28, 2  ;;  %v1764_v33 = vperm.slane %v1759_v28, 3  ;;  %v1762_v39 = vperm.slane %v1759_v28, 1 }
 0x53e   : > { %1959 = vmatpush.bf16.msra.mxu0 %v3143_v59  ;;  %2282 = vmatpush.bf16.msra.mxu2 %v3576_v4 }
 0x540   : > { %1975 = vmatpush.bf16.msra.mxu1 %v3099_v42  ;;  %2295 = vmatpush.bf16.msra.mxu3 %v3584_v12 }
 0x542   : > { %1960 = vmatpush.bf16.msra.mxu0 %v3127_v8  ;;  %v3583_v8 = vld [vmem:[%s3966_s14 + $0x68] sm:$0xff]  ;;  %2283 = vmatpush.bf16.msra.mxu2 %v3575_v7 }
 0x544   : > { %2320 = vmatpush.bf16.msrb.mxu1 %v3601_v47  ;;  %2296 = vmatpush.bf16.msra.mxu3 %v3583_v8 }
 0x546   : > { %1961 = vmatpush.bf16.msra.mxu0 %v3111_v23  ;;  %2284 = vmatpush.bf16.msra.mxu2 %v3574_v11  ;;  %v3586_v23 = vld [vmem:[%s3966_s14 + $0x80] sm:$0xff] }
 0x548   : > { %2321 = vmatpush.bf16.msrb.mxu1 %v3600_v40  ;;  %2297 = vmatpush.bf16.msra.mxu3 %v3582_v13 }
 0x54a   : > { %1962 = vmatpush.bf16.msra.mxu0 %v3095_v38  ;;  %2285 = vmatpush.bf16.msra.mxu2 %v3573_v16  ;;  %v1761_v38 = vperm.slane %v1759_v28, 0  ;;  %v3698_v28 = vld [vmem:[%s851_s28] ss:$0 sm:$0xff] }
 0x54c   : > { %2322 = vmatpush.bf16.msrb.mxu1 %v3599_v3  ;;  %2298 = vmatpush.bf16.msra.mxu3 %v3581_v17 }
 0x54e   : > { %2307 = vmatpush.bf16.msrb.mxu0 %v3593_v46  ;;  %2286 = vmatpush.bf16.msra.mxu2 %v3572_v20 }
 0x550   : > { %2323 = vmatpush.bf16.msrb.mxu1 %v3598_v6  ;;  %2299 = vmatpush.bf16.msra.mxu3 %v3580_v22 }
 0x552   : > { %2308 = vmatpush.bf16.msrb.mxu0 %v3592_v49  ;;  %2287 = vmatpush.bf16.msra.mxu2 %v3571_v26 }
 0x554   : > { %2324 = vmatpush.bf16.msrb.mxu1 %v3597_v10  ;;  %2300 = vmatpush.bf16.msra.mxu3 %v3579_v27 }
 0x556   : > { %2309 = vmatpush.bf16.msrb.mxu0 %v3591_v2  ;;  %2288 = vmatpush.bf16.msra.mxu2 %v3570_v29 }
 0x558   : > { %2325 = vmatpush.bf16.msrb.mxu1 %v3596_v15  ;;  %2301 = vmatpush.bf16.msra.mxu3 %v3578_v30 }
 0x55a   : > { %2310 = vmatpush.bf16.msrb.mxu0 %v3590_v5 }
 0x55c   : > { %2326 = vmatpush.bf16.msrb.mxu1 %v3595_v19 }
 0x55e   : > { %2311 = vmatpush.bf16.msrb.mxu0 %v3589_v9 }
 0x560   : > { %2327 = vmatpush.bf16.msrb.mxu1 %v3594_v24 }
 0x562   : > { %2312 = vmatpush.bf16.msrb.mxu0 %v3588_v14 }
 0x566   : > { %2313 = vmatpush.bf16.msrb.mxu0 %v3587_v18 }
 0x56a   : > { %2314 = vmatpush.bf16.msrb.mxu0 %v3586_v23 }
 0x5a0   : > { %v1690_v41 = vpop.xlane.xlu1 %1689 }
 0x5a1   : > { %v1698_v44 = vmul.f32 %v4293_v32, %v1690_v41 }
 0x5a2   : > { %v1701_v25 = vpop.xlane.xlu2 %1700 }
 0x5a3   : > { %v1703_v21 = vmul.f32 %v1698_v44, %v1698_v44  ;;  %v1702_v45 = vmul.f32 %v1701_v25, %v4293_v32  ;;  %v1705_v56 = vsub.f32 %v4219_v60, %v1698_v44 }
 0x5a5   : > { %v1704_v48 = vsub.f32 %v1702_v45, %v1703_v21 }
 0x5a7   : > { %v1706_v51 = vadd.f32 1e-12, %v1704_v48 }
 0x5a9   : > { %3711 = vrsqrt.f32 %v1706_v51  ;;  %vm1713_vm10 = vweird.f32 %v1706_v51 }
 0x5af   : > { %v3712_v52 = vpop.eup %3711 }
 0x5b0   : > { %v1708_v53 = vmul.f32 %v3712_v52, %v1706_v51  ;;  %vm1714_vm9 = vweird.f32 %v3712_v52 }
 0x5b1   : > { %vm1715_vm11 = vmor %vm1713_vm10, %vm1714_vm9 }
 0x5b2   : > { %v1709_v54 = vmul.f32 %v3712_v52, %v1708_v53 }
 0x5b4   : > { %v1710_v50 = vmul.f32 0.5, %v1709_v54 }
 0x5b6   : > { %v1711_v43 = vsub.f32 1.5, %v1710_v50 }
 0x5b8   : > { %v1712_v55 = vmul.f32 %v3712_v52, %v1711_v43 }
 0x5ba   : > { %v1716_v57 = vsel %vm1715_vm11, %v3712_v52, %v1712_v55 }
 0x5bb   : > { %v1717_v59 = vmul.f32 %v1716_v57, %v1705_v56 }
 0x5bd   : > { %v1721_v62 = vmul.f32 %v3696_v58, %v1717_v59 }
 0x5bf   : > { %v4316_v63 = vadd.f32 %v3697_v61, %v1721_v62 }
 0x5c1   : > { %v1726_v60 = vpack.c.bf16 %v4316_v63, %v4316_v63 }
 0x5c3   : > { %1937 = vmatmul.bf16.vlgmr.msrb.gmra.mxu2 %v1726_v60  ;;  %1950 = vmatmul.bf16.vlgmr.msrb.gmra.mxu3 %v1726_v60 }
 0x5c4   : > { %1963 = vmatmul.bf16.vlgmr.msra.gmra.mxu0 %v1726_v60  ;;  %1976 = vmatmul.bf16.vlgmr.msra.gmra.mxu1 %v1726_v60 }
 0x641   : > { %v1964_v34 = vpop.f32.mrf.mxu0  ;;  %v1977_v35 = vpop.f32.mrf.mxu1 }
 0x642   : > { %v1965_v36 = vadd.f32 %v1964_v34, %v1763_v31  ;;  %v1978_v37 = vadd.f32 %v1977_v35, %v1764_v33 }
 0x644   : > { %v1987_v41 = vmul.f32 0.044715, %v1965_v36  ;;  %v1988_v42 = vmul.f32 0.044715, %v1978_v37  ;;  %v1983_v12 = vmul.f32 0.5, %v1965_v36  ;;  %v1984_v6 = vmul.f32 0.5, %v1978_v37 }
 0x646   : > { %v1991_v44 = vmul.f32 %v1987_v41, %v1965_v36  ;;  %v1992_v25 = vmul.f32 %v1988_v42, %v1978_v37  ;;  %v1938_v21 = vpop.f32.mrf.mxu2  ;;  %v1951_v45 = vpop.f32.mrf.mxu3 }
 0x647   : > { %v1939_v46 = vadd.f32 %v1938_v21, %v1761_v38  ;;  %v1952_v47 = vadd.f32 %v1951_v45, %v1762_v39 }
 0x648   : > { %v1995_v48 = vmul.f32 %v1991_v44, %v1965_v36  ;;  %v1996_v49 = vmul.f32 %v1992_v25, %v1978_v37 }
 0x649   : > { %v1985_v40 = vmul.f32 0.044715, %v1939_v46  ;;  %v1986_v51 = vmul.f32 0.044715, %v1952_v47  ;;  %v1966_v52 = vpop.f32.mrf.mxu0  ;;  %v1979_v53 = vpop.f32.mrf.mxu1  ;;  %v1981_v15 = vmul.f32 0.5, %v1939_v46  ;;  %v1982_v17 = vmul.f32 0.5, %v1952_v47 }
 0x64a   : > { %v1999_v54 = vadd.f32 %v1995_v48, %v1965_v36  ;;  %v2000_v50 = vadd.f32 %v1996_v49, %v1978_v37 }
 0x64b   : > { %v1989_v43 = vmul.f32 %v1985_v40, %v1939_v46  ;;  %v1990_v55 = vmul.f32 %v1986_v51, %v1952_v47 }
 0x64c   : > { %v2003_v56 = vmul.f32 0.7978846, %v1999_v54  ;;  %v2004_v58 = vmul.f32 0.7978846, %v2000_v50  ;;  %v3699_v54 = vld [vmem:[%s854_s20] ss:$0 sm:$0xff] }
 0x64d   : > { %v1993_v57 = vmul.f32 %v1989_v43, %v1939_v46  ;;  %v1994_v59 = vmul.f32 %v1990_v55, %v1952_v47  ;;  %v3700_v50 = vld [vmem:[%s857_s8] ss:$0 sm:$0xff] }
 0x64e   : > { %v1940_v61 = vpop.f32.mrf.mxu2  ;;  %v1953_v62 = vpop.f32.mrf.mxu3  ;;  %3713 = vtanh.f32 %v2003_v56 }
 0x64f   : > { %3715 = vtanh.f32 %v2004_v58  ;;  %v1997_v60 = vadd.f32 %v1993_v57, %v1939_v46  ;;  %v1998_v0 = vadd.f32 %v1994_v59, %v1952_v47 }
 0x651   : > { %v2001_v1 = vmul.f32 0.7978846, %v1997_v60  ;;  %v2002_v2 = vmul.f32 0.7978846, %v1998_v0 }
 0x653   : > { %3717 = vtanh.f32 %v2001_v1 }
 0x654   : > { %v3714_v3 = vpop.eup %3713  ;;  %3719 = vtanh.f32 %v2002_v2 }
 0x655   : > { %v3716_v4 = vpop.eup %3715  ;;  %v2011_v5 = vadd.f32 1.0, %v3714_v3 }
 0x656   : > { %v2012_v7 = vadd.f32 1.0, %v3716_v4 }
 0x657   : > { %v2015_v8 = vmul.f32 %v2011_v5, %v1983_v12 }
 0x658   : > { %v2016_v9 = vmul.f32 %v2012_v7, %v1984_v6 }
 0x659   : > { %v3718_v10 = vpop.eup %3717  ;;  %v2019_v11 = vpack.c.bf16 %v2015_v8, %v2015_v8 }
 0x65a   : > { %v3720_v13 = vpop.eup %3719  ;;  %v2020_v14 = vpack.c.bf16 %v2016_v9, %v2016_v9  ;;  %v2009_v16 = vadd.f32 1.0, %v3718_v10 }
 0x65b   : > { %2315 = vmatmul.bf16.vlgmr.msrb.gmra.mxu0 %v2019_v11  ;;  %v2010_v18 = vadd.f32 1.0, %v3720_v13 }
 0x65c   : > { %2328 = vmatmul.bf16.vlgmr.msrb.gmra.mxu1 %v2020_v14  ;;  %v2013_v19 = vmul.f32 %v2009_v16, %v1981_v15 }
 0x65d   : > { %v2014_v20 = vmul.f32 %v2010_v18, %v1982_v17 }
 0x65e   : > { %v2017_v22 = vpack.c.bf16 %v2013_v19, %v2013_v19 }
 0x65f   : > { %v2018_v23 = vpack.c.bf16 %v2014_v20, %v2014_v20 }
 0x660   : > { %2289 = vmatmul.bf16.vlgmr.msra.gmra.mxu2 %v2017_v22 }
 0x661   : > { %2302 = vmatmul.bf16.vlgmr.msra.gmra.mxu3 %v2018_v23 }
 0x6d8   : > { %v2316_v24 = vpop.f32.mrf.mxu0 }
 0x6d9   : > { %v2329_v26 = vpop.f32.mrf.mxu1 }
 0x6e0   : > { %v2318_v27 = vpop.f32.mrf.mxu0 }
 0x6e1   : > { %v2331_v29 = vpop.f32.mrf.mxu1 }
 0x6e3   : > { %v2290_v30 = vpop.f32.mrf.mxu2 }
 0x6e4   : > { %v2291_v31 = vadd.f32 %v3698_v28, %v2290_v30  ;;  %v2303_v33 = vpop.f32.mrf.mxu3 }
 0x6e6   : > { %v2304_v34 = vadd.f32 %v2303_v33, %v2291_v31 }
 0x6e8   : > { %v2317_v35 = vadd.f32 %v2316_v24, %v2304_v34 }
 0x6ea   : > { %v2330_v36 = vadd.f32 %v2329_v26, %v2317_v35 }
 0x6eb   : > { %v2292_v37 = vpop.f32.mrf.mxu2 }
 0x6ec   : > { %v2305_v38 = vpop.f32.mrf.mxu3  ;;  %v2333_v39 = vadd.f32 %v2330_v36, %v4316_v63 }
 0x6ee   : > { %2336 = vadd.xlane.f32.xlu2 %v2333_v39  ;;  %v2339_v41 = vmul.f32 %v2333_v39, %v2333_v39 }
 0x6f0   : > { %2340 = vadd.xlane.f32.xlu0 %v2339_v41 }
 0x761   : > { %v2337_v42 = vpop.xlane.xlu2 %2336 }
 0x762   : > { %v2338_v44 = vmul.f32 %v2337_v42, %v4293_v32 }
 0x763   : > { %v2341_v25 = vpop.xlane.xlu0 %2340 }
 0x764   : > { %v2343_v21 = vmul.f32 %v2338_v44, %v2338_v44  ;;  %v2342_v45 = vmul.f32 %v2341_v25, %v4293_v32  ;;  %v2345_v53 = vsub.f32 %v2333_v39, %v2338_v44 }
 0x766   : > { %v2344_v46 = vsub.f32 %v2342_v45, %v2343_v21 }
 0x768   : > { %v2346_v47 = vadd.f32 1e-12, %v2344_v46 }
 0x76a   : > { %3721 = vrsqrt.f32 %v2346_v47  ;;  %vm2353_vm13 = vweird.f32 %v2346_v47 }
 0x770   : > { %v3722_v48 = vpop.eup %3721 }
 0x771   : > { %v2348_v49 = vmul.f32 %v3722_v48, %v2346_v47  ;;  %vm2354_vm12 = vweird.f32 %v3722_v48 }
 0x772   : > { %vm2355_vm14 = vmor %vm2353_vm13, %vm2354_vm12 }
 0x773   : > { %v2349_v40 = vmul.f32 %v3722_v48, %v2348_v49 }
 0x775   : > { %v2350_v51 = vmul.f32 0.5, %v2349_v40 }
 0x777   : > { %v2351_v63 = vsub.f32 1.5, %v2350_v51 }
 0x779   : > { %v2352_v52 = vmul.f32 %v3722_v48, %v2351_v63 }
 0x77b   : > { %v2356_v32 = vsel %vm2355_vm14, %v3722_v48, %v2352_v52 }
 0x77c   : > { %v2357_v43 = vmul.f32 %v2356_v32, %v2345_v53 }
 0x77e   : > { %v2361_v55 = vmul.f32 %v3699_v54, %v2357_v43  ;;  %2370 = sbr.rel (%p3340_p8) target bundleno = 2364 (0x93c), region = 112 }
 0x780   : > { %v2365_v56 = vadd.f32 %v3700_v50, %v2361_v55 }
 0x782   : > { %2366 = vst [vmem:[#allocation2] sm:$0xff] %v2365_v56 }
 0x783   : > { %v3609_v58 = vld [vmem:[%s4631_s1 + $0x38] sm:$0xff]  ;;  %v3608_v57 = vld [vmem:[%s4631_s1 + $0x30] sm:$0xff]  ;;  %v3423_v2 = vld [vmem:[%s4632_s0 + $0x60] sm:$0xf]  ;;  %v2371_v35 = vpack.c.bf16 %v2365_v56, %v2365_v56 }
 0x784   : > { %2440 = vmatpush.bf16.msra.mxu0 %v3609_v58  ;;  %v3431_v59 = vld [vmem:[%s4632_s0 + $0x70] sm:$0xf]  ;;  %v3625_v61 = vld [vmem:[%s4632_s0 + $0x74] sm:$0xf0]  ;;  %v3624_v62 = vld [vmem:[%s4632_s0 + $0x74] sm:$0xf] }
 0x785   : > { %v3433_v60 = vld [vmem:[%s4632_s0 + $0x78] sm:$0xf0]  ;;  %v3432_v0 = vor.u32 %v3625_v61, %v3431_v59  ;;  %v3623_v3 = vld [vmem:[%s4632_s0 + $0x64] sm:$0xf0]  ;;  %v3622_v4 = vld [vmem:[%s4632_s0 + $0x64] sm:$0xf] }
 0x786   : > { %v3436_v1 = vor.u32 %v3624_v62, %v3433_v60  ;;  %v3425_v12 = vld [vmem:[%s4632_s0 + $0x68] sm:$0xf0]  ;;  %v3424_v6 = vor.u32 %v3623_v3, %v3423_v2  ;;  %v3415_v8 = vld [vmem:[%s4632_s0 + $0x50] sm:$0xf]  ;;  %v3621_v9 = vld [vmem:[%s4632_s0 + $0x54] sm:$0xf0] }
 0x787   : > { %v3607_v5 = vld [vmem:[%s4631_s1 + $0x28] sm:$0xff]  ;;  %2557 = vmatpush.bf16.msra.mxu1 %v3432_v0  ;;  %v3428_v7 = vor.u32 %v3622_v4, %v3425_v12  ;;  %v3620_v10 = vld [vmem:[%s4632_s0 + $0x54] sm:$0xf]  ;;  %v3417_v11 = vld [vmem:[%s4632_s0 + $0x58] sm:$0xf0]  ;;  %v3416_v14 = vor.u32 %v3621_v9, %v3415_v8 }
 0x788   : > { %2441 = vmatpush.bf16.msra.mxu0 %v3608_v57  ;;  %2570 = vmatpush.bf16.msra.mxu2 %v3436_v1  ;;  %v3606_v13 = vld [vmem:[%s4631_s1 + $0x20] sm:$0xff]  ;;  %v3420_v15 = vor.u32 %v3620_v10, %v3417_v11  ;;  %v3619_v17 = vld [vmem:[%s4632_s0 + $0x44] sm:$0xf0]  ;;  %v3409_v19 = vld [vmem:[%s4632_s0 + $0x48] sm:$0xf0] }
 0x789   : > { %v3407_v16 = vld [vmem:[%s4632_s0 + $0x40] sm:$0xf]  ;;  %v3618_v18 = vld [vmem:[%s4632_s0 + $0x44] sm:$0xf]  ;;  %v3605_v20 = vld [vmem:[%s4631_s1 + $0x18] sm:$0xff] }
 0x78a   : > { %v3408_v22 = vor.u32 %v3619_v17, %v3407_v16  ;;  %v3412_v23 = vor.u32 %v3618_v18, %v3409_v19  ;;  %v3399_v24 = vld [vmem:[%s4632_s0 + $0x30] sm:$0xf]  ;;  %v3617_v26 = vld [vmem:[%s4632_s0 + $0x34] sm:$0xf0]  ;;  %v3616_v27 = vld [vmem:[%s4632_s0 + $0x34] sm:$0xf] }
 0x78b   : > { %2558 = vmatpush.bf16.msra.mxu1 %v3424_v6  ;;  %v3401_v28 = vld [vmem:[%s4632_s0 + $0x38] sm:$0xf0]  ;;  %v3604_v29 = vld [vmem:[%s4631_s1 + $0x10] sm:$0xff]  ;;  %v3400_v30 = vor.u32 %v3617_v26, %v3399_v24  ;;  %v3603_v33 = vld [vmem:[%s4631_s1 + $0x8] sm:$0xff] }
 0x78c   : > { %2442 = vmatpush.bf16.msra.mxu0 %v3607_v5  ;;  %2571 = vmatpush.bf16.msra.mxu2 %v3428_v7  ;;  %v3404_v31 = vor.u32 %v3616_v27, %v3401_v28  ;;  %v3602_v34 = vld [vmem:[%s4631_s1] sm:$0xff]  ;;  %v3615_v37 = vld [vmem:[%s4632_s0 + $0x24] sm:$0xf0]  ;;  %v3393_v41 = vld [vmem:[%s4632_s0 + $0x28] sm:$0xf0] }
 0x78d   : > { %v3391_v36 = vld [vmem:[%s4632_s0 + $0x20] sm:$0xf]  ;;  %v3614_v38 = vld [vmem:[%s4632_s0 + $0x24] sm:$0xf]  ;;  %v3383_v44 = vld [vmem:[%s4632_s0 + $0x10] sm:$0xf] }
 0x78e   : > { %v3392_v39 = vor.u32 %v3615_v37, %v3391_v36  ;;  %v3396_v42 = vor.u32 %v3614_v38, %v3393_v41  ;;  %v3613_v25 = vld [vmem:[%s4632_s0 + $0x14] sm:$0xf0]  ;;  %v3612_v21 = vld [vmem:[%s4632_s0 + $0x14] sm:$0xf]  ;;  %v3385_v46 = vld [vmem:[%s4632_s0 + $0x18] sm:$0xf0] }
 0x78f   : > { %2559 = vmatpush.bf16.msra.mxu1 %v3416_v14  ;;  %v3384_v45 = vor.u32 %v3613_v25, %v3383_v44  ;;  %v3388_v47 = vor.u32 %v3612_v21, %v3385_v46  ;;  %v3375_v48 = vld [vmem:[%s4632_s0] sm:$0xf]  ;;  %v3611_v49 = vld [vmem:[%s4632_s0 + $0x4] sm:$0xf0]  ;;  %v3610_v40 = vld [vmem:[%s4632_s0 + $0x4] sm:$0xf] }
 0x790   : > { %2443 = vmatpush.bf16.msra.mxu0 %v3606_v13  ;;  %2572 = vmatpush.bf16.msra.mxu2 %v3420_v15  ;;  %v3376_v51 = vor.u32 %v3611_v49, %v3375_v48  ;;  %v3377_v63 = vld [vmem:[%s4632_s0 + $0x8] sm:$0xf0]  ;;  %v3633_v53 = vld [vmem:[%s4633_s24 + $0x38] sm:$0xff]  ;;  %v3632_v32 = vld [vmem:[%s4633_s24 + $0x30] sm:$0xff] }
 0x791   : > { %v3380_v52 = vor.u32 %v3610_v40, %v3377_v63  ;;  %v3641_v54 = vld [vmem:[%s4633_s24 + $0x78] sm:$0xff]  ;;  %2719 = vmatpush.bf16.msra.mxu3 %v3633_v53  ;;  %v3640_v50 = vld [vmem:[%s4633_s24 + $0x70] sm:$0xff]  ;;  %v3631_v43 = vld [vmem:[%s4633_s24 + $0x28] sm:$0xff] }
 0x792   : > { %v3639_v55 = vld [vmem:[%s4633_s24 + $0x68] sm:$0xff]  ;;  %v3630_v56 = vld [vmem:[%s4633_s24 + $0x20] sm:$0xff]  ;;  %v3629_v57 = vld [vmem:[%s4633_s24 + $0x18] sm:$0xff] }
 0x793   : > { %2560 = vmatpush.bf16.msra.mxu1 %v3408_v22  ;;  %v3638_v58 = vld [vmem:[%s4633_s24 + $0x60] sm:$0xff]  ;;  %v3637_v59 = vld [vmem:[%s4633_s24 + $0x58] sm:$0xff]  ;;  %v3628_v62 = vld [vmem:[%s4633_s24 + $0x10] sm:$0xff] }
 0x794   : > { %2444 = vmatpush.bf16.msra.mxu0 %v3605_v20  ;;  %2573 = vmatpush.bf16.msra.mxu2 %v3412_v23  ;;  %v3723_v61 = vld [vmem:[%s4634_s26] ss:$0 sm:$0xff]  ;;  %v3627_v4 = vld [vmem:[%s4633_s24 + $0x8] sm:$0xff]  ;;  %v3636_v12 = vld [vmem:[%s4633_s24 + $0x50] sm:$0xff] }
 0x795   : > { %2720 = vmatpush.bf16.msra.mxu3 %v3632_v32  ;;  %v3626_v5 = vld [vmem:[%s4633_s24] sm:$0xff]  ;;  %v3635_v6 = vld [vmem:[%s4633_s24 + $0x48] sm:$0xff] }
 0x796   : > { %v3634_v7 = vld [vmem:[%s4633_s24 + $0x40] sm:$0xff] }
 0x797   : > { %2561 = vmatpush.bf16.msra.mxu1 %v3400_v30  ;;  %v2471_v8 = vld [vmem:[%s4635_s3] sm:$0x3] }
 0x798   : > { %2445 = vmatpush.bf16.msra.mxu0 %v3604_v29  ;;  %2574 = vmatpush.bf16.msra.mxu2 %v3404_v31  ;;  %v2473_v9 = vperm.slane %v2471_v8, 0  ;;  %v2474_v14 = vperm.slane %v2471_v8, 1  ;;  %v3724_v23 = vld [vmem:[%s4636_s22] ss:$0 sm:$0xff] }
 0x799   : > { %2721 = vmatpush.bf16.msra.mxu3 %v3631_v43 }
 0x79b   : > { %2562 = vmatpush.bf16.msra.mxu1 %v3392_v39 }
 0x79c   : > { %2446 = vmatpush.bf16.msra.mxu0 %v3603_v33  ;;  %2575 = vmatpush.bf16.msra.mxu2 %v3396_v42 }
 0x79d   : > { %2722 = vmatpush.bf16.msra.mxu3 %v3630_v56 }
 0x79f   : > { %2563 = vmatpush.bf16.msra.mxu1 %v3384_v45 }
 0x7a0   : > { %2447 = vmatpush.bf16.msra.mxu0 %v3602_v34  ;;  %2576 = vmatpush.bf16.msra.mxu2 %v3388_v47 }
 0x7a1   : > { %2723 = vmatpush.bf16.msra.mxu3 %v3629_v57 }
 0x7a3   : > { %2448 = vmatmul.bf16.vlgmr.msra.gmra.mxu0 %v2371_v35  ;;  %2564 = vmatpush.bf16.msra.mxu1 %v3376_v51 }
 0x7a4   : > { %2577 = vmatpush.bf16.msra.mxu2 %v3380_v52  ;;  %2732 = vmatpush.bf16.msrb.mxu0 %v3641_v54 }
 0x7a5   : > { %2724 = vmatpush.bf16.msra.mxu3 %v3628_v62 }
 0x7a8   : > { %2733 = vmatpush.bf16.msrb.mxu0 %v3640_v50 }
 0x7a9   : > { %2725 = vmatpush.bf16.msra.mxu3 %v3627_v4 }
 0x7ac   : > { %2734 = vmatpush.bf16.msrb.mxu0 %v3639_v55 }
 0x7ad   : > { %2726 = vmatpush.bf16.msra.mxu3 %v3626_v5 }
 0x7b0   : > { %2735 = vmatpush.bf16.msrb.mxu0 %v3638_v58 }
 0x7b4   : > { %2736 = vmatpush.bf16.msrb.mxu0 %v3637_v59 }
 0x7b8   : > { %2737 = vmatpush.bf16.msrb.mxu0 %v3636_v12 }
 0x7bc   : > { %2738 = vmatpush.bf16.msrb.mxu0 %v3635_v6 }
 0x7c0   : > { %2739 = vmatpush.bf16.msrb.mxu0 %v3634_v7 }
 0x820   : > { %v2449_v60 = vpop.f32.mrf.mxu0 }
 0x821   : > { %v2450_v0 = vadd.f32 %v3723_v61, %v2449_v60 }
 0x823   : > { %3725 = vtanh.f32 %v2450_v0 }
 0x828   : > { %v2451_v1 = vpop.f32.mrf.mxu0 }
 0x829   : > { %v3726_v2 = vpop.eup %3725 }
 0x82a   : > { %v2454_v3 = vpack.c.bf16 %v3726_v2, %v3726_v2 }
 0x82c   : > { %2565 = vmatmul.bf16.vlgmr.msra.gmra.mxu1 %v2454_v3  ;;  %2578 = vmatmul.bf16.vlgmr.msra.gmra.mxu2 %v2454_v3 }
 0x8a9   : > { %v2566_v10 = vpop.f32.mrf.mxu1 }
 0x8aa   : > { %v2567_v11 = vadd.f32 %v2566_v10, %v2473_v9 }
 0x8ac   : > { %v2583_v13 = vmax.f32 %v2567_v11, 0.0 }
 0x8ae   : > { %v2585_v15 = vpack.c.bf16 %v2583_v13, %v2583_v13 }
 0x8af   : > { %v2579_v16 = vpop.f32.mrf.mxu2 }
 0x8b0   : > { %v2580_v17 = vadd.f32 %v2579_v16, %v2474_v14  ;;  %2727 = vmatmul.bf16.vlgmr.msra.gmra.mxu3 %v2585_v15 }
 0x8b1   : > { %v2568_v18 = vpop.f32.mrf.mxu1 }
 0x8b2   : > { %v2584_v19 = vmax.f32 %v2580_v17, 0.0 }
 0x8b4   : > { %v2586_v20 = vpack.c.bf16 %v2584_v19, %v2584_v19 }
 0x8b6   : > { %2740 = vmatmul.bf16.vlgmr.msrb.gmra.mxu0 %v2586_v20 }
 0x8b7   : > { %v2581_v22 = vpop.f32.mrf.mxu2 }
 0x933   : > { %v2728_v24 = vpop.f32.mrf.mxu3  ;;  %v2741_v26 = vpop.f32.mrf.mxu0 }
 0x934   : > { %v2729_v27 = vadd.f32 %v3724_v23, %v2728_v24 }
 0x936   : > { %v2742_v28 = vadd.f32 %v2741_v26, %v2729_v27 }
 0x938   : > { %2745 = vst [vmem:[%s3983_s10] sm:$0xff] %v2742_v28 }
 0x93b   : > { %v2730_v29 = vpop.f32.mrf.mxu3  ;;  %v2743_v30 = vpop.f32.mrf.mxu0 }
 0x93c PF: > { %s4637_s19 = sld [smem:[#allocation6_spill]] }
 0x93d   : > { %s4638_s2 = sld [smem:[#allocation4_spill]] }
 0x93e   : > { %s4639_s25 = sld [smem:[#allocation5_spill]] }
 0x93f   : > { %s4640_s26 = sld [smem:[#allocation7_spill]] }
 0x940   : > { %s4641_s27 = sld [smem:[#allocation8_spill]] }
 0x942   : > { %s31_s3 = sadd.s32 1, %s4637_s19  }
 0x943   : > { %p28_p9 = scmp.ge.s32.totalorder %s31_s3, 6  }
 0x945   :  { %30 = sbr.rel (!%p28_p9) target bundleno = 18 (0x12), region = 178 }

</bundles_post_ra>
